<compile_context>
chip_gen: v7x
topology: tpu7x:2x2x1
jax: 0.10.0
libtpu: 0.0.40
codegen_flags: <defaults>
</compile_context>

<pallas_src>
import math
import functools

import jax
import jax.numpy as jnp
import numpy as np
from jax import lax
from jax.experimental import pallas as pl
from jax.experimental.pallas import tpu as pltpu

EPS = 1e-5  # BatchNorm1d default eps


def _gelu_erf(z):
    """Exact (erf-based) GELU via Abramowitz & Stegun 7.1.26 (|err| <= 1.5e-7).

    The 1/(1 + p*|u|) divide runs on the EUP (pl.reciprocal approx) so the widest
    elementwise tensor in the block, (R, 4D), stays off the VALU divide path.
    """
    a1, a2, a3, a4, a5 = 0.254829592, -0.284496736, 1.421413741, -1.453152027, 1.061405429
    pc = 0.3275911
    u = z * (1.0 / math.sqrt(2.0))
    au = jnp.abs(u)
    t = pl.reciprocal(1.0 + pc * au, approx=True)
    poly = ((((a5 * t + a4) * t + a3) * t + a2) * t + a1) * t
    erf_abs = 1.0 - poly * jnp.exp(-au * au)
    erf = jnp.where(u >= 0, erf_abs, -erf_abs)
    return 0.5 * z * (1.0 + erf)


# --------------------------------------------------------------------------------------
# GPTBlock kernel (optionally fused with the final GPT.linear1 epilogue)
# --------------------------------------------------------------------------------------
def gpt_block_kernel(x_ref,
                     wqkv_ref, bqkv_ref,          # (D, 3D) bf16 / (1, 3D) f32
                     wo_ref, bo_ref,              # (D, D)  bf16 / (1, D)  f32
                     s1_ref, t1_ref,              # folded bn1 scale/shift, (1, D) f32
                     w1_ref, bf1_ref, w2_ref, bf2_ref,   # MLP weights bf16 / biases f32
                     s2_ref, t2_ref,              # folded bn2 scale/shift, (1, D) f32
                     *rest, n_heads, fuse_linear):
    if fuse_linear:
        wlin_ref, blin_ref, o_ref = rest
    else:
        (o_ref,) = rest

    bf16, f32 = jnp.bfloat16, jnp.float32
    x = x_ref[...]                                 # (TB, S, D) f32
    TB, S, D = x.shape
    hd = D // n_heads
    R = TB * S
    x2 = x.reshape(R, D)                           # row-batched slab for all dense matmuls

    # ---- fused, lane-dense QKV projection: one (R, D) @ (D, 3D) MXU pass ----
    qkv = jnp.dot(x2.astype(bf16), wqkv_ref[...], preferred_element_type=f32) + bqkv_ref[...]

    # Head split via static lane slices stacked on a new leading (major) head axis.
    def heads(base):
        return jnp.stack([qkv[:, base + h * hd: base + (h + 1) * hd]
                          for h in range(n_heads)], axis=0)        # (H, R, hd) f32

    qh = heads(0) * (1.0 / math.sqrt(hd))
    kh = heads(D)
    vh = heads(2 * D)

    # Causal mask from a single 2-D iota pair; broadcast across heads inside the where.
    row = lax.broadcasted_iota(jnp.int32, (S, S), 0)
    col = lax.broadcasted_iota(jnp.int32, (S, S), 1)
    keep = col <= row

    # ---- attention core: per batch element, all heads batched in one 3-D einsum ----
    att_rows = []
    for tb in range(TB):
        sl = slice(tb * S, (tb + 1) * S)
        qb = qh[:, sl, :].astype(bf16)
        kb = kh[:, sl, :].astype(bf16)
        vb = vh[:, sl, :].astype(bf16)
        s = jnp.einsum('hqe,hke->hqk', qb, kb, preferred_element_type=f32)     # (H, S, S)
        s = jnp.where(keep, s, -1e30)                                          # causal mask
        m = jnp.max(s, axis=-1, keepdims=True)
        p = jnp.exp(s - m)
        w = p * pl.reciprocal(jnp.sum(p, axis=-1, keepdims=True), approx=True)  # softmax
        # dropout on attention weights is identity in eval mode.
        ctx = jnp.einsum('hqk,hke->hqe', w.astype(bf16), vb,
                         preferred_element_type=f32)                            # (H, S, hd)
        # Concatenate heads back onto the lane axis -> (S, D): matches PyTorch permute+view.
        att_rows.append(jnp.concatenate([ctx[h] for h in range(n_heads)], axis=-1))
    att = att_rows[0] if TB == 1 else jnp.concatenate(att_rows, axis=0)         # (R, D)

    # ---- output projection: one lane-dense (R, D) @ (D, D) matmul (head reduction on MXU) ----
    att = jnp.dot(att.astype(bf16), wo_ref[...], preferred_element_type=f32) + bo_ref[...]

    res1 = x2 + att                                                             # logits + att

    # bn1 (eval, folded): per-d_model-channel affine.
    adn = res1 * s1_ref[...] + t1_ref[...]

    # fcn: Linear -> exact GELU -> Linear.  (dropout on res1 is identity in eval.)
    h1 = jnp.dot(res1.astype(bf16), w1_ref[...], preferred_element_type=f32) + bf1_ref[...]
    h1 = _gelu_erf(h1)
    ff = jnp.dot(h1.astype(bf16), w2_ref[...], preferred_element_type=f32) + bf2_ref[...]

    # bn2 (eval, folded) on (fcn_out + adn_logits).
    y = (ff + adn) * s2_ref[...] + t2_ref[...]

    if fuse_linear:
        # GPT.linear1 fused as an epilogue of the last block (saves an HBM round trip).
        y = jnp.dot(y.astype(bf16), wlin_ref[...], preferred_element_type=f32) + blin_ref[...]

    o_ref[...] = y.reshape(o_ref.shape)


# --------------------------------------------------------------------------------------
# Standalone final Linear (only used if there are zero GPT blocks)
# --------------------------------------------------------------------------------------
def linear_kernel(x_ref, w_ref, b_ref, o_ref):
    o_ref[...] = (jnp.dot(x_ref[...].astype(jnp.bfloat16), w_ref[...],
                          preferred_element_type=jnp.float32) + b_ref[...])


def linear_pallas(x, w, b):
    B, S, D = x.shape
    Dout = w.shape[1]
    x2 = x.reshape(B * S, D)          # single lane/sublane-dense matmul, one grid step
    out = pl.pallas_call(
        linear_kernel,
        out_shape=jax.ShapeDtypeStruct((B * S, Dout), jnp.float32),
        compiler_params=pltpu.CompilerParams(vmem_limit_bytes=48 << 20),
    )(x2, w.astype(jnp.bfloat16), b.astype(jnp.float32))
    return out.reshape(B, S, Dout)


# --------------------------------------------------------------------------------------
# Wrappers
# --------------------------------------------------------------------------------------
def fold_block_params(raw, n_heads):
    """Fuse QKV weights, fold BN eval params to scale/shift, cast matmul weights to bf16."""
    del n_heads  # layout no longer depends on the head count
    f32, bf16 = jnp.float32, jnp.bfloat16

    def bn_fold(g, be, mean, var):
        s = (g / jnp.sqrt(var + EPS)).astype(f32)
        return s, (be - mean * s).astype(f32)

    s1, t1 = bn_fold(raw["g1"], raw["be1"], raw["m1"], raw["v1"])
    s2, t2 = bn_fold(raw["g2"], raw["be2"], raw["m2"], raw["v2"])
    wqkv = jnp.concatenate([raw["wq"], raw["wk"], raw["wv"]], axis=1).astype(bf16)
    bqkv = jnp.concatenate([raw["bq"], raw["bk"], raw["bv"]], axis=1).astype(f32)
    return [wqkv, bqkv,
            raw["wo"].astype(bf16), raw["bo"].astype(f32),
            s1, t1,
            raw["w1"].astype(bf16), raw["bf1"].astype(f32),
            raw["w2"].astype(bf16), raw["bf2"].astype(f32),
            s2, t2]


def _pick_block_batch(B, S, max_rows=512):
    """Largest divisor of B whose row slab (TB*S) stays within a modest VMEM budget."""
    tb = 1
    for cand in range(1, B + 1):
        if B % cand == 0 and cand * S <= max_rows:
            tb = cand
    return tb


def _const_spec(shape, single_buffer):
    nd = len(shape)
    index_map = lambda b, _nd=nd: (0,) * _nd
    if single_buffer:
        # Grid-invariant weights: no need to double-buffer (halves resident weight VMEM).
        return pl.BlockSpec(shape, index_map, pipeline_mode=pl.Buffered(1))
    return pl.BlockSpec(shape, index_map)


def _gpt_block_call(x, prepped, n_heads, fuse_linear, single_buffer_weights):
    B, S, D = x.shape
    TB = _pick_block_batch(B, S)
    operands = list(prepped)
    if fuse_linear is not None:
        operands += list(fuse_linear)
        Dout = fuse_linear[0].shape[1]
    else:
        Dout = D

    kernel = functools.partial(gpt_block_kernel, n_heads=n_heads,
                               fuse_linear=fuse_linear is not None)

    in_specs = [pl.BlockSpec((TB, S, D), lambda b: (b, 0, 0))]
    in_specs += [_const_spec(w.shape, single_buffer_weights) for w in operands]

    param_bytes = sum(int(np.prod(w.shape)) * w.dtype.itemsize for w in operands)
    # rough per-step working set: in/out activation blocks + main f32 intermediates.
    inter_bytes = 4 * (TB * S * (3 * D + 4 * D + 2 * D + Dout) + n_heads * S * S)
    block_bytes = param_bytes + 2 * 4 * TB * S * (D + Dout) + inter_bytes
    # Stay well below v7x's 64 MiB physical VMEM per TensorCore (v5e/v6e have 128 MiB).
    vmem_limit = int(min(48 << 20, max(2 * block_bytes + (4 << 20), 16 << 20)))

    flops = B * (24 * S * D * D + 4 * S * S * D)
    if fuse_linear is not None:
        flops += 2 * B * S * D * Dout
    transcendentals = B * (n_heads * S * S + 8 * S * D)
    bytes_accessed = 4 * B * S * (D + Dout) + param_bytes

    return pl.pallas_call(
        kernel,
        out_shape=jax.ShapeDtypeStruct((B, S, Dout), jnp.float32),
        grid_spec=pltpu.PrefetchScalarGridSpec(
            num_scalar_prefetch=0,
            grid=(B // TB,),                       # one grid step per TB-sized batch block
            in_specs=in_specs,
            out_specs=pl.BlockSpec((TB, S, Dout), lambda b: (b, 0, 0)),
        ),
        compiler_params=pltpu.CompilerParams(
            dimension_semantics=("parallel",),     # batch blocks are independent
            vmem_limit_bytes=vmem_limit,
        ),
        cost_estimate=pl.CostEstimate(
            flops=int(flops), transcendentals=int(transcendentals),
            bytes_accessed=int(bytes_accessed)),
    )(x, *operands)


def gpt_block_pallas(x, prepped, n_heads, fuse_linear=None):
    try:
        return _gpt_block_call(x, prepped, n_heads, fuse_linear, single_buffer_weights=True)
    except Exception:
        # pl.Buffered(1) (single-buffered grid-invariant weights) not supported by this
        # JAX version -> fall back to default double-buffering.
        return _gpt_block_call(x, prepped, n_heads, fuse_linear, single_buffer_weights=False)


def gpt_forward_pallas(x, layer_params, lin_w, lin_b, n_heads):
    if not layer_params:
        return linear_pallas(x, lin_w, lin_b)
    h = x
    last = len(layer_params) - 1
    for i, raw in enumerate(layer_params):
        prepped = fold_block_params(raw, n_heads)
        fuse = (lin_w.astype(jnp.bfloat16), lin_b.astype(jnp.float32)) if i == last else None
        h = gpt_block_pallas(h, prepped, n_heads, fuse_linear=fuse)
    return h


# --------------------------------------------------------------------------------------
# Parameter init + pure-JAX reference (eval-mode PyTorch forward)
# --------------------------------------------------------------------------------------
def init_block_params(key, d_model):
    d = d_model
    keys = iter(jax.random.split(key, 32))

    def nrm(shape, scale=0.02):
        return scale * jax.random.normal(next(keys), shape, jnp.float32)

    p = {}
    p["wq"], p["bq"] = nrm((d, d)), nrm((1, d))
    p["wk"], p["bk"] = nrm((d, d)), nrm((1, d))
    p["wv"], p["bv"] = nrm((d, d)), nrm((1, d))
    p["wo"], p["bo"] = nrm((d, d)), nrm((1, d))
    p["g1"], p["be1"] = 1.0 + nrm((1, d), 0.1), nrm((1, d), 0.1)
    p["m1"] = nrm((1, d), 0.1)
    p["v1"] = 0.5 + jax.random.uniform(next(keys), (1, d), jnp.float32)
    p["w1"], p["bf1"] = nrm((d, 4 * d)), nrm((1, 4 * d))
    p["w2"], p["bf2"] = nrm((4 * d, d)), nrm((1, d))
    p["g2"], p["be2"] = 1.0 + nrm((1, d), 0.1), nrm((1, d), 0.1)
    p["m2"] = nrm((1, d), 0.1)
    p["v2"] = 0.5 + jax.random.uniform(next(keys), (1, d), jnp.float32)
    return p


def gpt_block_reference(x, p, n_heads):
    B, S, D = x.shape
    hd = D // n_heads
    q = (x @ p["wq"] + p["bq"]).reshape(B, S, n_heads, hd).transpose(0, 2, 1, 3)
    k = (x @ p["wk"] + p["bk"]).reshape(B, S, n_heads, hd).transpose(0, 2, 1, 3)
    v = (x @ p["wv"] + p["bv"]).reshape(B, S, n_heads, hd).transpose(0, 2, 1, 3)
    scores = jnp.einsum("bhqd,bhkd->bhqk", q, k) / math.sqrt(hd)
    mask = jnp.triu(jnp.ones((S, S), bool), k=1)
    scores = jnp.where(mask, -jnp.inf, scores)
    w = jax.nn.softmax(scores, axis=-1)
    att = jnp.einsum("bhqk,bhkd->bhqd", w, v).transpose(0, 2, 1, 3).reshape(B, S, D)
    att = att @ p["wo"] + p["bo"]
    res1 = x + att
    adn = (res1 - p["m1"]) / jnp.sqrt(p["v1"] + EPS) * p["g1"] + p["be1"]
    h = jax.nn.gelu(res1 @ p["w1"] + p["bf1"], approximate=False)
    ff = h @ p["w2"] + p["bf2"]
    res2 = ff + adn
    return (res2 - p["m2"]) / jnp.sqrt(p["v2"] + EPS) * p["g2"] + p["be2"]


def gpt_reference(x, layer_params, lin_w, lin_b, n_heads):
    h = x
    for p in layer_params:
        h = gpt_block_reference(h, p, n_heads)
    return h @ lin_w + lin_b


if __name__ == "__main__":
    B, S, D, H, L = 2, 8, 32, 4, 2   # batch, seq, d_model, n_heads, n_layers
    key = jax.random.PRNGKey(0)
    kx, kp = jax.random.split(key)
    x = jax.random.normal(kx, (B, S, D), jnp.float32)

    layer_keys = jax.random.split(kp, L + 1)
    layers = [init_block_params(layer_keys[i], D) for i in range(L)]
    k1, k2 = jax.random.split(layer_keys[L])
    lin_w = 0.02 * jax.random.normal(k1, (D, D), jnp.float32)
    lin_b = 0.02 * jax.random.normal(k2, (1, D), jnp.float32)

    out = gpt_forward_pallas(x, layers, lin_w, lin_b, H)
    out = jax.block_until_ready(out)

    ref = gpt_reference(x, layers, lin_w, lin_b, H)
    assert out.shape == (B, S, D) and out.dtype == jnp.float32
    # bf16 matmul operands + approx reciprocals + erf approximation -> loosened tolerance.
    np.testing.assert_allclose(np.asarray(out), np.asarray(ref), rtol=5e-2, atol=2e-2)
    print("KERNEL_OK")
</pallas_src>

<mosaic_0001>
module attributes {stable_mosaic.version = 11 : i64} {
  func.func @gpt_block_kernel(%arg0: i32, %arg1: memref<2x8x32xf32, #tpu.memory_space<vmem>>, %arg2: memref<32x96xbf16, #tpu.memory_space<vmem>>, %arg3: memref<1x96xf32, #tpu.memory_space<vmem>>, %arg4: memref<32x32xbf16, #tpu.memory_space<vmem>>, %arg5: memref<1x32xf32, #tpu.memory_space<vmem>>, %arg6: memref<1x32xf32, #tpu.memory_space<vmem>>, %arg7: memref<1x32xf32, #tpu.memory_space<vmem>>, %arg8: memref<32x128xbf16, #tpu.memory_space<vmem>>, %arg9: memref<1x128xf32, #tpu.memory_space<vmem>>, %arg10: memref<128x32xbf16, #tpu.memory_space<vmem>>, %arg11: memref<1x32xf32, #tpu.memory_space<vmem>>, %arg12: memref<1x32xf32, #tpu.memory_space<vmem>>, %arg13: memref<1x32xf32, #tpu.memory_space<vmem>>, %arg14: memref<2x8x32xf32, #tpu.memory_space<vmem>>) attributes {dimension_semantics = [#tpu.dimension_semantics<parallel>], iteration_bounds = array<i64: 1>, scalar_prefetch = 0 : i64, scratch_operands = 0 : i64, tpu.core_type = #tpu.core_type<tc>, window_params = [{transform_indices = @transform_0, window_bounds = array<i64: 2, 8, 32>}, {pipeline_mode = #tpu.pipeline_mode<synchronous>, transform_indices = @transform_1, window_bounds = array<i64: 32, 96>}, {pipeline_mode = #tpu.pipeline_mode<synchronous>, transform_indices = @transform_2, window_bounds = array<i64: 1, 96>}, {pipeline_mode = #tpu.pipeline_mode<synchronous>, transform_indices = @transform_3, window_bounds = array<i64: 32, 32>}, {pipeline_mode = #tpu.pipeline_mode<synchronous>, transform_indices = @transform_4, window_bounds = array<i64: 1, 32>}, {pipeline_mode = #tpu.pipeline_mode<synchronous>, transform_indices = @transform_5, window_bounds = array<i64: 1, 32>}, {pipeline_mode = #tpu.pipeline_mode<synchronous>, transform_indices = @transform_6, window_bounds = array<i64: 1, 32>}, {pipeline_mode = #tpu.pipeline_mode<synchronous>, transform_indices = @transform_7, window_bounds = array<i64: 32, 128>}, {pipeline_mode = #tpu.pipeline_mode<synchronous>, transform_indices = @transform_8, window_bounds = array<i64: 1, 128>}, {pipeline_mode = #tpu.pipeline_mode<synchronous>, transform_indices = @transform_9, window_bounds = array<i64: 128, 32>}, {pipeline_mode = #tpu.pipeline_mode<synchronous>, transform_indices = @transform_10, window_bounds = array<i64: 1, 32>}, {pipeline_mode = #tpu.pipeline_mode<synchronous>, transform_indices = @transform_11, window_bounds = array<i64: 1, 32>}, {pipeline_mode = #tpu.pipeline_mode<synchronous>, transform_indices = @transform_12, window_bounds = array<i64: 1, 32>}, {transform_indices = @transform_13, window_bounds = array<i64: 2, 8, 32>}]} {
    %c0 = arith.constant 0 : index
    %c0_0 = arith.constant 0 : index
    %c0_1 = arith.constant 0 : index
    %0 = vector.load %arg1[%c0, %c0_0, %c0_1] : memref<2x8x32xf32, #tpu.memory_space<vmem>>, vector<2x8x32xf32>
    %1 = vector.shape_cast %0 : vector<2x8x32xf32> to vector<16x32xf32>
    %2 = arith.truncf %1 : vector<16x32xf32> to vector<16x32xbf16>
    %c0_2 = arith.constant 0 : index
    %c0_3 = arith.constant 0 : index
    %3 = vector.load %arg2[%c0_2, %c0_3] : memref<32x96xbf16, #tpu.memory_space<vmem>>, vector<32x96xbf16>
    %cst = arith.constant dense<0.000000e+00> : vector<16x96xf32>
    %4 = tpu.matmul %2, %3, %cst {dimension_numbers = #tpu.dot_dimension_numbers<[1], [0], [0], [1], [0, 0, 1, 1], [], []>} : vector<16x32xbf16>, vector<32x96xbf16>, vector<16x96xf32> -> vector<16x96xf32>
    %c0_4 = arith.constant 0 : index
    %c0_5 = arith.constant 0 : index
    %5 = vector.load %arg3[%c0_4, %c0_5] : memref<1x96xf32, #tpu.memory_space<vmem>>, vector<1x96xf32>
    %6 = vector.broadcast %5 : vector<1x96xf32> to vector<16x96xf32>
    %7 = arith.addf %4, %6 : vector<16x96xf32>
    %8 = vector.extract_strided_slice %7 {offsets = [0, 0], sizes = [16, 8], strides = [1, 1]} : vector<16x96xf32> to vector<16x8xf32>
    %9 = vector.extract_strided_slice %7 {offsets = [0, 8], sizes = [16, 8], strides = [1, 1]} : vector<16x96xf32> to vector<16x8xf32>
    %10 = vector.extract_strided_slice %7 {offsets = [0, 16], sizes = [16, 8], strides = [1, 1]} : vector<16x96xf32> to vector<16x8xf32>
    %11 = vector.extract_strided_slice %7 {offsets = [0, 24], sizes = [16, 8], strides = [1, 1]} : vector<16x96xf32> to vector<16x8xf32>
    %12 = vector.shape_cast %8 : vector<16x8xf32> to vector<1x16x8xf32>
    %13 = vector.shape_cast %9 : vector<16x8xf32> to vector<1x16x8xf32>
    %14 = vector.shape_cast %10 : vector<16x8xf32> to vector<1x16x8xf32>
    %15 = vector.shape_cast %11 : vector<16x8xf32> to vector<1x16x8xf32>
    %16 = tpu.concatenate %12, %13, %14, %15 in 0 : vector<1x16x8xf32>, vector<1x16x8xf32>, vector<1x16x8xf32>, vector<1x16x8xf32> -> vector<4x16x8xf32>
    %cst_6 = arith.constant 0.353553385 : f32
    %17 = vector.broadcast %cst_6 : f32 to vector<4x16x8xf32>
    %18 = arith.mulf %16, %17 : vector<4x16x8xf32>
    %19 = vector.extract_strided_slice %7 {offsets = [0, 32], sizes = [16, 8], strides = [1, 1]} : vector<16x96xf32> to vector<16x8xf32>
    %20 = vector.extract_strided_slice %7 {offsets = [0, 40], sizes = [16, 8], strides = [1, 1]} : vector<16x96xf32> to vector<16x8xf32>
    %21 = vector.extract_strided_slice %7 {offsets = [0, 48], sizes = [16, 8], strides = [1, 1]} : vector<16x96xf32> to vector<16x8xf32>
    %22 = vector.extract_strided_slice %7 {offsets = [0, 56], sizes = [16, 8], strides = [1, 1]} : vector<16x96xf32> to vector<16x8xf32>
    %23 = vector.shape_cast %19 : vector<16x8xf32> to vector<1x16x8xf32>
    %24 = vector.shape_cast %20 : vector<16x8xf32> to vector<1x16x8xf32>
    %25 = vector.shape_cast %21 : vector<16x8xf32> to vector<1x16x8xf32>
    %26 = vector.shape_cast %22 : vector<16x8xf32> to vector<1x16x8xf32>
    %27 = tpu.concatenate %23, %24, %25, %26 in 0 : vector<1x16x8xf32>, vector<1x16x8xf32>, vector<1x16x8xf32>, vector<1x16x8xf32> -> vector<4x16x8xf32>
    %28 = vector.extract_strided_slice %7 {offsets = [0, 64], sizes = [16, 8], strides = [1, 1]} : vector<16x96xf32> to vector<16x8xf32>
    %29 = vector.extract_strided_slice %7 {offsets = [0, 72], sizes = [16, 8], strides = [1, 1]} : vector<16x96xf32> to vector<16x8xf32>
    %30 = vector.extract_strided_slice %7 {offsets = [0, 80], sizes = [16, 8], strides = [1, 1]} : vector<16x96xf32> to vector<16x8xf32>
    %31 = vector.extract_strided_slice %7 {offsets = [0, 88], sizes = [16, 8], strides = [1, 1]} : vector<16x96xf32> to vector<16x8xf32>
    %32 = vector.shape_cast %28 : vector<16x8xf32> to vector<1x16x8xf32>
    %33 = vector.shape_cast %29 : vector<16x8xf32> to vector<1x16x8xf32>
    %34 = vector.shape_cast %30 : vector<16x8xf32> to vector<1x16x8xf32>
    %35 = vector.shape_cast %31 : vector<16x8xf32> to vector<1x16x8xf32>
    %36 = tpu.concatenate %32, %33, %34, %35 in 0 : vector<1x16x8xf32>, vector<1x16x8xf32>, vector<1x16x8xf32>, vector<1x16x8xf32> -> vector<4x16x8xf32>
    %37 = tpu.iota {dimensions = array<i32: 0>} : vector<8x8xi32>
    %38 = tpu.iota {dimensions = array<i32: 1>} : vector<8x8xi32>
    %39 = arith.cmpi sle, %38, %37 : vector<8x8xi32>
    %40 = vector.extract_strided_slice %18 {offsets = [0, 0, 0], sizes = [4, 8, 8], strides = [1, 1, 1]} : vector<4x16x8xf32> to vector<4x8x8xf32>
    %41 = arith.truncf %40 : vector<4x8x8xf32> to vector<4x8x8xbf16>
    %42 = vector.extract_strided_slice %27 {offsets = [0, 0, 0], sizes = [4, 8, 8], strides = [1, 1, 1]} : vector<4x16x8xf32> to vector<4x8x8xf32>
    %43 = arith.truncf %42 : vector<4x8x8xf32> to vector<4x8x8xbf16>
    %44 = vector.extract_strided_slice %36 {offsets = [0, 0, 0], sizes = [4, 8, 8], strides = [1, 1, 1]} : vector<4x16x8xf32> to vector<4x8x8xf32>
    %45 = arith.truncf %44 : vector<4x8x8xf32> to vector<4x8x8xbf16>
    "tpu.trace_start"() <{level = 10 : i32, message = "hqe,hke->hqk"}> : () -> ()
    %cst_7 = arith.constant dense<0.000000e+00> : vector<4x8x8xf32>
    %46 = tpu.matmul %41, %43, %cst_7 {dimension_numbers = #tpu.dot_dimension_numbers<[2], [2], [1], [1], [0, 0, 0, 1, 1, 1], [0], [0]>} : vector<4x8x8xbf16>, vector<4x8x8xbf16>, vector<4x8x8xf32> -> vector<4x8x8xf32>
    %cst_8 = arith.constant -1.000000e+30 : f32
    "tpu.trace_stop"() : () -> ()
    %47 = vector.shape_cast %39 : vector<8x8xi1> to vector<1x8x8xi1>
    %48 = vector.broadcast %47 : vector<1x8x8xi1> to vector<4x8x8xi1>
    %49 = vector.broadcast %cst_8 : f32 to vector<4x8x8xf32>
    %50 = arith.select %48, %46, %49 : vector<4x8x8xi1>, vector<4x8x8xf32>
    %cst_9 = arith.constant dense<0xFF800000> : vector<4x8xf32>
    %51 = vector.multi_reduction <maximumf>, %50, %cst_9 [2] : vector<4x8x8xf32> to vector<4x8xf32>
    %52 = vector.shape_cast %51 : vector<4x8xf32> to vector<4x8x1xf32>
    %53 = vector.broadcast %52 : vector<4x8x1xf32> to vector<4x8x8xf32>
    %54 = arith.subf %50, %53 : vector<4x8x8xf32>
    %55 = math.exp %54 : vector<4x8x8xf32>
    %cst_10 = arith.constant dense<0.000000e+00> : vector<4x8xf32>
    %56 = vector.multi_reduction <add>, %55, %cst_10 [2] : vector<4x8x8xf32> to vector<4x8xf32>
    %57 = vector.shape_cast %56 : vector<4x8xf32> to vector<4x8x1xf32>
    %58 = tpu.reciprocal %57 {approx = true} : vector<4x8x1xf32> -> vector<4x8x1xf32>
    %59 = vector.broadcast %58 : vector<4x8x1xf32> to vector<4x8x8xf32>
    %60 = arith.mulf %55, %59 : vector<4x8x8xf32>
    %61 = arith.truncf %60 : vector<4x8x8xf32> to vector<4x8x8xbf16>
    "tpu.trace_start"() <{level = 10 : i32, message = "hqk,hke->hqe"}> : () -> ()
    %cst_11 = arith.constant dense<0.000000e+00> : vector<4x8x8xf32>
    %62 = tpu.matmul %61, %45, %cst_11 {dimension_numbers = #tpu.dot_dimension_numbers<[2], [1], [1], [2], [0, 0, 0, 1, 1, 2], [0], [0]>} : vector<4x8x8xbf16>, vector<4x8x8xbf16>, vector<4x8x8xf32> -> vector<4x8x8xf32>
    "tpu.trace_stop"() : () -> ()
    %63 = vector.extract_strided_slice %62 {offsets = [0, 0, 0], sizes = [1, 8, 8], strides = [1, 1, 1]} : vector<4x8x8xf32> to vector<1x8x8xf32>
    %64 = vector.shape_cast %63 : vector<1x8x8xf32> to vector<8x8xf32>
    %65 = vector.extract_strided_slice %62 {offsets = [1, 0, 0], sizes = [1, 8, 8], strides = [1, 1, 1]} : vector<4x8x8xf32> to vector<1x8x8xf32>
    %66 = vector.shape_cast %65 : vector<1x8x8xf32> to vector<8x8xf32>
    %67 = vector.extract_strided_slice %62 {offsets = [2, 0, 0], sizes = [1, 8, 8], strides = [1, 1, 1]} : vector<4x8x8xf32> to vector<1x8x8xf32>
    %68 = vector.shape_cast %67 : vector<1x8x8xf32> to vector<8x8xf32>
    %69 = vector.extract_strided_slice %62 {offsets = [3, 0, 0], sizes = [1, 8, 8], strides = [1, 1, 1]} : vector<4x8x8xf32> to vector<1x8x8xf32>
    %70 = vector.shape_cast %69 : vector<1x8x8xf32> to vector<8x8xf32>
    %71 = tpu.concatenate %64, %66, %68, %70 in 1 : vector<8x8xf32>, vector<8x8xf32>, vector<8x8xf32>, vector<8x8xf32> -> vector<8x32xf32>
    %72 = vector.extract_strided_slice %18 {offsets = [0, 8, 0], sizes = [4, 8, 8], strides = [1, 1, 1]} : vector<4x16x8xf32> to vector<4x8x8xf32>
    %73 = arith.truncf %72 : vector<4x8x8xf32> to vector<4x8x8xbf16>
    %74 = vector.extract_strided_slice %27 {offsets = [0, 8, 0], sizes = [4, 8, 8], strides = [1, 1, 1]} : vector<4x16x8xf32> to vector<4x8x8xf32>
    %75 = arith.truncf %74 : vector<4x8x8xf32> to vector<4x8x8xbf16>
    %76 = vector.extract_strided_slice %36 {offsets = [0, 8, 0], sizes = [4, 8, 8], strides = [1, 1, 1]} : vector<4x16x8xf32> to vector<4x8x8xf32>
    %77 = arith.truncf %76 : vector<4x8x8xf32> to vector<4x8x8xbf16>
    "tpu.trace_start"() <{level = 10 : i32, message = "hqe,hke->hqk"}> : () -> ()
    %cst_12 = arith.constant dense<0.000000e+00> : vector<4x8x8xf32>
    %78 = tpu.matmul %73, %75, %cst_12 {dimension_numbers = #tpu.dot_dimension_numbers<[2], [2], [1], [1], [0, 0, 0, 1, 1, 1], [0], [0]>} : vector<4x8x8xbf16>, vector<4x8x8xbf16>, vector<4x8x8xf32> -> vector<4x8x8xf32>
    %cst_13 = arith.constant -1.000000e+30 : f32
    "tpu.trace_stop"() : () -> ()
    %79 = vector.shape_cast %39 : vector<8x8xi1> to vector<1x8x8xi1>
    %80 = vector.broadcast %79 : vector<1x8x8xi1> to vector<4x8x8xi1>
    %81 = vector.broadcast %cst_13 : f32 to vector<4x8x8xf32>
    %82 = arith.select %80, %78, %81 : vector<4x8x8xi1>, vector<4x8x8xf32>
    %cst_14 = arith.constant dense<0xFF800000> : vector<4x8xf32>
    %83 = vector.multi_reduction <maximumf>, %82, %cst_14 [2] : vector<4x8x8xf32> to vector<4x8xf32>
    %84 = vector.shape_cast %83 : vector<4x8xf32> to vector<4x8x1xf32>
    %85 = vector.broadcast %84 : vector<4x8x1xf32> to vector<4x8x8xf32>
    %86 = arith.subf %82, %85 : vector<4x8x8xf32>
    %87 = math.exp %86 : vector<4x8x8xf32>
    %cst_15 = arith.constant dense<0.000000e+00> : vector<4x8xf32>
    %88 = vector.multi_reduction <add>, %87, %cst_15 [2] : vector<4x8x8xf32> to vector<4x8xf32>
    %89 = vector.shape_cast %88 : vector<4x8xf32> to vector<4x8x1xf32>
    %90 = tpu.reciprocal %89 {approx = true} : vector<4x8x1xf32> -> vector<4x8x1xf32>
    %91 = vector.broadcast %90 : vector<4x8x1xf32> to vector<4x8x8xf32>
    %92 = arith.mulf %87, %91 : vector<4x8x8xf32>
    %93 = arith.truncf %92 : vector<4x8x8xf32> to vector<4x8x8xbf16>
    "tpu.trace_start"() <{level = 10 : i32, message = "hqk,hke->hqe"}> : () -> ()
    %cst_16 = arith.constant dense<0.000000e+00> : vector<4x8x8xf32>
    %94 = tpu.matmul %93, %77, %cst_16 {dimension_numbers = #tpu.dot_dimension_numbers<[2], [1], [1], [2], [0, 0, 0, 1, 1, 2], [0], [0]>} : vector<4x8x8xbf16>, vector<4x8x8xbf16>, vector<4x8x8xf32> -> vector<4x8x8xf32>
    "tpu.trace_stop"() : () -> ()
    %95 = vector.extract_strided_slice %94 {offsets = [0, 0, 0], sizes = [1, 8, 8], strides = [1, 1, 1]} : vector<4x8x8xf32> to vector<1x8x8xf32>
    %96 = vector.shape_cast %95 : vector<1x8x8xf32> to vector<8x8xf32>
    %97 = vector.extract_strided_slice %94 {offsets = [1, 0, 0], sizes = [1, 8, 8], strides = [1, 1, 1]} : vector<4x8x8xf32> to vector<1x8x8xf32>
    %98 = vector.shape_cast %97 : vector<1x8x8xf32> to vector<8x8xf32>
    %99 = vector.extract_strided_slice %94 {offsets = [2, 0, 0], sizes = [1, 8, 8], strides = [1, 1, 1]} : vector<4x8x8xf32> to vector<1x8x8xf32>
    %100 = vector.shape_cast %99 : vector<1x8x8xf32> to vector<8x8xf32>
    %101 = vector.extract_strided_slice %94 {offsets = [3, 0, 0], sizes = [1, 8, 8], strides = [1, 1, 1]} : vector<4x8x8xf32> to vector<1x8x8xf32>
    %102 = vector.shape_cast %101 : vector<1x8x8xf32> to vector<8x8xf32>
    %103 = tpu.concatenate %96, %98, %100, %102 in 1 : vector<8x8xf32>, vector<8x8xf32>, vector<8x8xf32>, vector<8x8xf32> -> vector<8x32xf32>
    %104 = tpu.concatenate %71, %103 in 0 : vector<8x32xf32>, vector<8x32xf32> -> vector<16x32xf32>
    %105 = arith.truncf %104 : vector<16x32xf32> to vector<16x32xbf16>
    %c0_17 = arith.constant 0 : index
    %c0_18 = arith.constant 0 : index
    %106 = vector.load %arg4[%c0_17, %c0_18] : memref<32x32xbf16, #tpu.memory_space<vmem>>, vector<32x32xbf16>
    %cst_19 = arith.constant dense<0.000000e+00> : vector<16x32xf32>
    %107 = tpu.matmul %105, %106, %cst_19 {dimension_numbers = #tpu.dot_dimension_numbers<[1], [0], [0], [1], [0, 0, 1, 1], [], []>} : vector<16x32xbf16>, vector<32x32xbf16>, vector<16x32xf32> -> vector<16x32xf32>
    %c0_20 = arith.constant 0 : index
    %c0_21 = arith.constant 0 : index
    %108 = vector.load %arg5[%c0_20, %c0_21] : memref<1x32xf32, #tpu.memory_space<vmem>>, vector<1x32xf32>
    %109 = vector.broadcast %108 : vector<1x32xf32> to vector<16x32xf32>
    %110 = arith.addf %107, %109 : vector<16x32xf32>
    %111 = arith.addf %1, %110 : vector<16x32xf32>
    %c0_22 = arith.constant 0 : index
    %c0_23 = arith.constant 0 : index
    %112 = vector.load %arg6[%c0_22, %c0_23] : memref<1x32xf32, #tpu.memory_space<vmem>>, vector<1x32xf32>
    %113 = vector.broadcast %112 : vector<1x32xf32> to vector<16x32xf32>
    %114 = arith.mulf %111, %113 : vector<16x32xf32>
    %c0_24 = arith.constant 0 : index
    %c0_25 = arith.constant 0 : index
    %115 = vector.load %arg7[%c0_24, %c0_25] : memref<1x32xf32, #tpu.memory_space<vmem>>, vector<1x32xf32>
    %116 = vector.broadcast %115 : vector<1x32xf32> to vector<16x32xf32>
    %117 = arith.addf %114, %116 : vector<16x32xf32>
    %118 = arith.truncf %111 : vector<16x32xf32> to vector<16x32xbf16>
    %c0_26 = arith.constant 0 : index
    %c0_27 = arith.constant 0 : index
    %119 = vector.load %arg8[%c0_26, %c0_27] : memref<32x128xbf16, #tpu.memory_space<vmem>>, vector<32x128xbf16>
    %cst_28 = arith.constant dense<0.000000e+00> : vector<16x128xf32>
    %120 = tpu.matmul %118, %119, %cst_28 {dimension_numbers = #tpu.dot_dimension_numbers<[1], [0], [0], [1], [0, 0, 1, 1], [], []>} : vector<16x32xbf16>, vector<32x128xbf16>, vector<16x128xf32> -> vector<16x128xf32>
    %c0_29 = arith.constant 0 : index
    %c0_30 = arith.constant 0 : index
    %121 = vector.load %arg9[%c0_29, %c0_30] : memref<1x128xf32, #tpu.memory_space<vmem>>, vector<1x128xf32>
    %122 = vector.broadcast %121 : vector<1x128xf32> to vector<16x128xf32>
    %123 = arith.addf %120, %122 : vector<16x128xf32>
    %cst_31 = arith.constant 0.707106769 : f32
    %124 = vector.broadcast %cst_31 : f32 to vector<16x128xf32>
    %125 = arith.mulf %123, %124 : vector<16x128xf32>
    %126 = math.absf %125 : vector<16x128xf32>
    %cst_32 = arith.constant 0.327591091 : f32
    %127 = vector.broadcast %cst_32 : f32 to vector<16x128xf32>
    %128 = arith.mulf %127, %126 : vector<16x128xf32>
    %cst_33 = arith.constant 1.000000e+00 : f32
    %129 = vector.broadcast %cst_33 : f32 to vector<16x128xf32>
    %130 = arith.addf %129, %128 : vector<16x128xf32>
    %131 = tpu.reciprocal %130 {approx = true} : vector<16x128xf32> -> vector<16x128xf32>
    %cst_34 = arith.constant 1.06140542 : f32
    %132 = vector.broadcast %cst_34 : f32 to vector<16x128xf32>
    %133 = arith.mulf %132, %131 : vector<16x128xf32>
    %cst_35 = arith.constant -1.45315206 : f32
    %134 = vector.broadcast %cst_35 : f32 to vector<16x128xf32>
    %135 = arith.addf %133, %134 : vector<16x128xf32>
    %136 = arith.mulf %135, %131 : vector<16x128xf32>
    %cst_36 = arith.constant 1.42141378 : f32
    %137 = vector.broadcast %cst_36 : f32 to vector<16x128xf32>
    %138 = arith.addf %136, %137 : vector<16x128xf32>
    %139 = arith.mulf %138, %131 : vector<16x128xf32>
    %cst_37 = arith.constant -0.284496725 : f32
    %140 = vector.broadcast %cst_37 : f32 to vector<16x128xf32>
    %141 = arith.addf %139, %140 : vector<16x128xf32>
    %142 = arith.mulf %141, %131 : vector<16x128xf32>
    %cst_38 = arith.constant 0.254829586 : f32
    %143 = vector.broadcast %cst_38 : f32 to vector<16x128xf32>
    %144 = arith.addf %142, %143 : vector<16x128xf32>
    %145 = arith.mulf %144, %131 : vector<16x128xf32>
    %cst_39 = arith.constant 0.000000e+00 : f32
    %146 = vector.broadcast %cst_39 : f32 to vector<16x128xf32>
    %147 = arith.subf %146, %126 : vector<16x128xf32>
    %148 = arith.mulf %147, %126 : vector<16x128xf32>
    %149 = math.exp %148 : vector<16x128xf32>
    %150 = arith.mulf %145, %149 : vector<16x128xf32>
    %cst_40 = arith.constant 1.000000e+00 : f32
    %151 = vector.broadcast %cst_40 : f32 to vector<16x128xf32>
    %152 = arith.subf %151, %150 : vector<16x128xf32>
    %cst_41 = arith.constant 0.000000e+00 : f32
    %153 = vector.broadcast %cst_41 : f32 to vector<16x128xf32>
    %154 = arith.cmpf oge, %125, %153 : vector<16x128xf32>
    %cst_42 = arith.constant 0.000000e+00 : f32
    %155 = vector.broadcast %cst_42 : f32 to vector<16x128xf32>
    %156 = arith.subf %155, %152 : vector<16x128xf32>
    %157 = arith.select %154, %152, %156 : vector<16x128xi1>, vector<16x128xf32>
    %cst_43 = arith.constant 5.000000e-01 : f32
    %158 = vector.broadcast %cst_43 : f32 to vector<16x128xf32>
    %159 = arith.mulf %158, %123 : vector<16x128xf32>
    %cst_44 = arith.constant 1.000000e+00 : f32
    %160 = vector.broadcast %cst_44 : f32 to vector<16x128xf32>
    %161 = arith.addf %160, %157 : vector<16x128xf32>
    %162 = arith.mulf %159, %161 : vector<16x128xf32>
    %163 = arith.truncf %162 : vector<16x128xf32> to vector<16x128xbf16>
    %c0_45 = arith.constant 0 : index
    %c0_46 = arith.constant 0 : index
    %164 = vector.load %arg10[%c0_45, %c0_46] : memref<128x32xbf16, #tpu.memory_space<vmem>>, vector<128x32xbf16>
    %cst_47 = arith.constant dense<0.000000e+00> : vector<16x32xf32>
    %165 = tpu.matmul %163, %164, %cst_47 {dimension_numbers = #tpu.dot_dimension_numbers<[1], [0], [0], [1], [0, 0, 1, 1], [], []>} : vector<16x128xbf16>, vector<128x32xbf16>, vector<16x32xf32> -> vector<16x32xf32>
    %c0_48 = arith.constant 0 : index
    %c0_49 = arith.constant 0 : index
    %166 = vector.load %arg11[%c0_48, %c0_49] : memref<1x32xf32, #tpu.memory_space<vmem>>, vector<1x32xf32>
    %167 = vector.broadcast %166 : vector<1x32xf32> to vector<16x32xf32>
    %168 = arith.addf %165, %167 : vector<16x32xf32>
    %169 = arith.addf %168, %117 : vector<16x32xf32>
    %c0_50 = arith.constant 0 : index
    %c0_51 = arith.constant 0 : index
    %170 = vector.load %arg12[%c0_50, %c0_51] : memref<1x32xf32, #tpu.memory_space<vmem>>, vector<1x32xf32>
    %171 = vector.broadcast %170 : vector<1x32xf32> to vector<16x32xf32>
    %172 = arith.mulf %169, %171 : vector<16x32xf32>
    %c0_52 = arith.constant 0 : index
    %c0_53 = arith.constant 0 : index
    %173 = vector.load %arg13[%c0_52, %c0_53] : memref<1x32xf32, #tpu.memory_space<vmem>>, vector<1x32xf32>
    %174 = vector.broadcast %173 : vector<1x32xf32> to vector<16x32xf32>
    %175 = arith.addf %172, %174 : vector<16x32xf32>
    %176 = vector.shape_cast %175 : vector<16x32xf32> to vector<2x8x32xf32>
    %c0_54 = arith.constant 0 : index
    %c0_55 = arith.constant 0 : index
    %c0_56 = arith.constant 0 : index
    %177 = vector.load %arg14[%c0_54, %c0_55, %c0_56] : memref<2x8x32xf32, #tpu.memory_space<vmem>>, vector<2x8x32xf32>
    tpu.vector_store %arg14[%c0_54, %c0_55, %c0_56], %176 {strides = array<i32>} : memref<2x8x32xf32, #tpu.memory_space<vmem>>, vector<2x8x32xf32>,
    return
  }
  func.func @transform_0(%arg0: i32) -> (i32, i32, i32) {
    %c0_i32 = arith.constant 0 : i32
    %c0_i32_0 = arith.constant 0 : i32
    %c0_i32_1 = arith.constant 0 : i32
    return %arg0, %c0_i32, %c0_i32_0 : i32, i32, i32
  }
  func.func @transform_1(%arg0: i32) -> (i32, i32) {
    %c0_i32 = arith.constant 0 : i32
    %c0_i32_0 = arith.constant 0 : i32
    %c0_i32_1 = arith.constant 0 : i32
    return %c0_i32, %c0_i32_0 : i32, i32
  }
  func.func @transform_2(%arg0: i32) -> (i32, i32) {
    %c0_i32 = arith.constant 0 : i32
    %c0_i32_0 = arith.constant 0 : i32
    %c0_i32_1 = arith.constant 0 : i32
    return %c0_i32, %c0_i32_0 : i32, i32
  }
  func.func @transform_3(%arg0: i32) -> (i32, i32) {
    %c0_i32 = arith.constant 0 : i32
    %c0_i32_0 = arith.constant 0 : i32
    %c0_i32_1 = arith.constant 0 : i32
    return %c0_i32, %c0_i32_0 : i32, i32
  }
  func.func @transform_4(%arg0: i32) -> (i32, i32) {
    %c0_i32 = arith.constant 0 : i32
    %c0_i32_0 = arith.constant 0 : i32
    %c0_i32_1 = arith.constant 0 : i32
    return %c0_i32, %c0_i32_0 : i32, i32
  }
  func.func @transform_5(%arg0: i32) -> (i32, i32) {
    %c0_i32 = arith.constant 0 : i32
    %c0_i32_0 = arith.constant 0 : i32
    %c0_i32_1 = arith.constant 0 : i32
    return %c0_i32, %c0_i32_0 : i32, i32
  }
  func.func @transform_6(%arg0: i32) -> (i32, i32) {
    %c0_i32 = arith.constant 0 : i32
    %c0_i32_0 = arith.constant 0 : i32
    %c0_i32_1 = arith.constant 0 : i32
    return %c0_i32, %c0_i32_0 : i32, i32
  }
  func.func @transform_7(%arg0: i32) -> (i32, i32) {
    %c0_i32 = arith.constant 0 : i32
    %c0_i32_0 = arith.constant 0 : i32
    %c0_i32_1 = arith.constant 0 : i32
    return %c0_i32, %c0_i32_0 : i32, i32
  }
  func.func @transform_8(%arg0: i32) -> (i32, i32) {
    %c0_i32 = arith.constant 0 : i32
    %c0_i32_0 = arith.constant 0 : i32
    %c0_i32_1 = arith.constant 0 : i32
    return %c0_i32, %c0_i32_0 : i32, i32
  }
  func.func @transform_9(%arg0: i32) -> (i32, i32) {
    %c0_i32 = arith.constant 0 : i32
    %c0_i32_0 = arith.constant 0 : i32
    %c0_i32_1 = arith.constant 0 : i32
    return %c0_i32, %c0_i32_0 : i32, i32
  }
  func.func @transform_10(%arg0: i32) -> (i32, i32) {
    %c0_i32 = arith.constant 0 : i32
    %c0_i32_0 = arith.constant 0 : i32
    %c0_i32_1 = arith.constant 0 : i32
    return %c0_i32, %c0_i32_0 : i32, i32
  }
  func.func @transform_11(%arg0: i32) -> (i32, i32) {
    %c0_i32 = arith.constant 0 : i32
    %c0_i32_0 = arith.constant 0 : i32
    %c0_i32_1 = arith.constant 0 : i32
    return %c0_i32, %c0_i32_0 : i32, i32
  }
  func.func @transform_12(%arg0: i32) -> (i32, i32) {
    %c0_i32 = arith.constant 0 : i32
    %c0_i32_0 = arith.constant 0 : i32
    %c0_i32_1 = arith.constant 0 : i32
    return %c0_i32, %c0_i32_0 : i32, i32
  }
  func.func @transform_13(%arg0: i32) -> (i32, i32, i32) {
    %c0_i32 = arith.constant 0 : i32
    %c0_i32_0 = arith.constant 0 : i32
    %c0_i32_1 = arith.constant 0 : i32
    return %arg0, %c0_i32, %c0_i32_0 : i32, i32, i32
  }
}

module attributes {stable_mosaic.version = 11 : i64} {
  func.func @gpt_block_kernel(%arg0: i32, %arg1: memref<2x8x32xf32, #tpu.memory_space<vmem>>, %arg2: memref<32x96xbf16, #tpu.memory_space<vmem>>, %arg3: memref<1x96xf32, #tpu.memory_space<vmem>>, %arg4: memref<32x32xbf16, #tpu.memory_space<vmem>>, %arg5: memref<1x32xf32, #tpu.memory_space<vmem>>, %arg6: memref<1x32xf32, #tpu.memory_space<vmem>>, %arg7: memref<1x32xf32, #tpu.memory_space<vmem>>, %arg8: memref<32x128xbf16, #tpu.memory_space<vmem>>, %arg9: memref<1x128xf32, #tpu.memory_space<vmem>>, %arg10: memref<128x32xbf16, #tpu.memory_space<vmem>>, %arg11: memref<1x32xf32, #tpu.memory_space<vmem>>, %arg12: memref<1x32xf32, #tpu.memory_space<vmem>>, %arg13: memref<1x32xf32, #tpu.memory_space<vmem>>, %arg14: memref<2x8x32xf32, #tpu.memory_space<vmem>>) attributes {dimension_semantics = [#tpu.dimension_semantics<parallel>], iteration_bounds = array<i64: 1>, scalar_prefetch = 0 : i64, scratch_operands = 0 : i64, tpu.core_type = #tpu.core_type<tc>, window_params = [{transform_indices = @transform_0, window_bounds = array<i64: 2, 8, 32>}, {pipeline_mode = #tpu.pipeline_mode<synchronous>, transform_indices = @transform_1, window_bounds = array<i64: 32, 96>}, {pipeline_mode = #tpu.pipeline_mode<synchronous>, transform_indices = @transform_2, window_bounds = array<i64: 1, 96>}, {pipeline_mode = #tpu.pipeline_mode<synchronous>, transform_indices = @transform_3, window_bounds = array<i64: 32, 32>}, {pipeline_mode = #tpu.pipeline_mode<synchronous>, transform_indices = @transform_4, window_bounds = array<i64: 1, 32>}, {pipeline_mode = #tpu.pipeline_mode<synchronous>, transform_indices = @transform_5, window_bounds = array<i64: 1, 32>}, {pipeline_mode = #tpu.pipeline_mode<synchronous>, transform_indices = @transform_6, window_bounds = array<i64: 1, 32>}, {pipeline_mode = #tpu.pipeline_mode<synchronous>, transform_indices = @transform_7, window_bounds = array<i64: 32, 128>}, {pipeline_mode = #tpu.pipeline_mode<synchronous>, transform_indices = @transform_8, window_bounds = array<i64: 1, 128>}, {pipeline_mode = #tpu.pipeline_mode<synchronous>, transform_indices = @transform_9, window_bounds = array<i64: 128, 32>}, {pipeline_mode = #tpu.pipeline_mode<synchronous>, transform_indices = @transform_10, window_bounds = array<i64: 1, 32>}, {pipeline_mode = #tpu.pipeline_mode<synchronous>, transform_indices = @transform_11, window_bounds = array<i64: 1, 32>}, {pipeline_mode = #tpu.pipeline_mode<synchronous>, transform_indices = @transform_12, window_bounds = array<i64: 1, 32>}, {transform_indices = @transform_13, window_bounds = array<i64: 2, 8, 32>}]} {
    %c0 = arith.constant 0 : index
    %c0_0 = arith.constant 0 : index
    %c0_1 = arith.constant 0 : index
    %0 = vector.load %arg1[%c0, %c0_0, %c0_1] : memref<2x8x32xf32, #tpu.memory_space<vmem>>, vector<2x8x32xf32>
    %1 = vector.shape_cast %0 : vector<2x8x32xf32> to vector<16x32xf32>
    %2 = arith.truncf %1 : vector<16x32xf32> to vector<16x32xbf16>
    %c0_2 = arith.constant 0 : index
    %c0_3 = arith.constant 0 : index
    %3 = vector.load %arg2[%c0_2, %c0_3] : memref<32x96xbf16, #tpu.memory_space<vmem>>, vector<32x96xbf16>
    %cst = arith.constant dense<0.000000e+00> : vector<16x96xf32>
    %4 = tpu.matmul %2, %3, %cst {dimension_numbers = #tpu.dot_dimension_numbers<[1], [0], [0], [1], [0, 0, 1, 1], [], []>} : vector<16x32xbf16>, vector<32x96xbf16>, vector<16x96xf32> -> vector<16x96xf32>
    %c0_4 = arith.constant 0 : index
    %c0_5 = arith.constant 0 : index
    %5 = vector.load %arg3[%c0_4, %c0_5] : memref<1x96xf32, #tpu.memory_space<vmem>>, vector<1x96xf32>
    %6 = vector.broadcast %5 : vector<1x96xf32> to vector<16x96xf32>
    %7 = arith.addf %4, %6 : vector<16x96xf32>
    %8 = vector.extract_strided_slice %7 {offsets = [0, 0], sizes = [16, 8], strides = [1, 1]} : vector<16x96xf32> to vector<16x8xf32>
    %9 = vector.extract_strided_slice %7 {offsets = [0, 8], sizes = [16, 8], strides = [1, 1]} : vector<16x96xf32> to vector<16x8xf32>
    %10 = vector.extract_strided_slice %7 {offsets = [0, 16], sizes = [16, 8], strides = [1, 1]} : vector<16x96xf32> to vector<16x8xf32>
    %11 = vector.extract_strided_slice %7 {offsets = [0, 24], sizes = [16, 8], strides = [1, 1]} : vector<16x96xf32> to vector<16x8xf32>
    %12 = vector.shape_cast %8 : vector<16x8xf32> to vector<1x16x8xf32>
    %13 = vector.shape_cast %9 : vector<16x8xf32> to vector<1x16x8xf32>
    %14 = vector.shape_cast %10 : vector<16x8xf32> to vector<1x16x8xf32>
    %15 = vector.shape_cast %11 : vector<16x8xf32> to vector<1x16x8xf32>
    %16 = tpu.concatenate %12, %13, %14, %15 in 0 : vector<1x16x8xf32>, vector<1x16x8xf32>, vector<1x16x8xf32>, vector<1x16x8xf32> -> vector<4x16x8xf32>
    %cst_6 = arith.constant 0.353553385 : f32
    %17 = vector.broadcast %cst_6 : f32 to vector<4x16x8xf32>
    %18 = arith.mulf %16, %17 : vector<4x16x8xf32>
    %19 = vector.extract_strided_slice %7 {offsets = [0, 32], sizes = [16, 8], strides = [1, 1]} : vector<16x96xf32> to vector<16x8xf32>
    %20 = vector.extract_strided_slice %7 {offsets = [0, 40], sizes = [16, 8], strides = [1, 1]} : vector<16x96xf32> to vector<16x8xf32>
    %21 = vector.extract_strided_slice %7 {offsets = [0, 48], sizes = [16, 8], strides = [1, 1]} : vector<16x96xf32> to vector<16x8xf32>
    %22 = vector.extract_strided_slice %7 {offsets = [0, 56], sizes = [16, 8], strides = [1, 1]} : vector<16x96xf32> to vector<16x8xf32>
    %23 = vector.shape_cast %19 : vector<16x8xf32> to vector<1x16x8xf32>
    %24 = vector.shape_cast %20 : vector<16x8xf32> to vector<1x16x8xf32>
    %25 = vector.shape_cast %21 : vector<16x8xf32> to vector<1x16x8xf32>
    %26 = vector.shape_cast %22 : vector<16x8xf32> to vector<1x16x8xf32>
    %27 = tpu.concatenate %23, %24, %25, %26 in 0 : vector<1x16x8xf32>, vector<1x16x8xf32>, vector<1x16x8xf32>, vector<1x16x8xf32> -> vector<4x16x8xf32>
    %28 = vector.extract_strided_slice %7 {offsets = [0, 64], sizes = [16, 8], strides = [1, 1]} : vector<16x96xf32> to vector<16x8xf32>
    %29 = vector.extract_strided_slice %7 {offsets = [0, 72], sizes = [16, 8], strides = [1, 1]} : vector<16x96xf32> to vector<16x8xf32>
    %30 = vector.extract_strided_slice %7 {offsets = [0, 80], sizes = [16, 8], strides = [1, 1]} : vector<16x96xf32> to vector<16x8xf32>
    %31 = vector.extract_strided_slice %7 {offsets = [0, 88], sizes = [16, 8], strides = [1, 1]} : vector<16x96xf32> to vector<16x8xf32>
    %32 = vector.shape_cast %28 : vector<16x8xf32> to vector<1x16x8xf32>
    %33 = vector.shape_cast %29 : vector<16x8xf32> to vector<1x16x8xf32>
    %34 = vector.shape_cast %30 : vector<16x8xf32> to vector<1x16x8xf32>
    %35 = vector.shape_cast %31 : vector<16x8xf32> to vector<1x16x8xf32>
    %36 = tpu.concatenate %32, %33, %34, %35 in 0 : vector<1x16x8xf32>, vector<1x16x8xf32>, vector<1x16x8xf32>, vector<1x16x8xf32> -> vector<4x16x8xf32>
    %37 = tpu.iota {dimensions = array<i32: 0>} : vector<8x8xi32>
    %38 = tpu.iota {dimensions = array<i32: 1>} : vector<8x8xi32>
    %39 = arith.cmpi sle, %38, %37 : vector<8x8xi32>
    %40 = vector.extract_strided_slice %18 {offsets = [0, 0, 0], sizes = [4, 8, 8], strides = [1, 1, 1]} : vector<4x16x8xf32> to vector<4x8x8xf32>
    %41 = arith.truncf %40 : vector<4x8x8xf32> to vector<4x8x8xbf16>
    %42 = vector.extract_strided_slice %27 {offsets = [0, 0, 0], sizes = [4, 8, 8], strides = [1, 1, 1]} : vector<4x16x8xf32> to vector<4x8x8xf32>
    %43 = arith.truncf %42 : vector<4x8x8xf32> to vector<4x8x8xbf16>
    %44 = vector.extract_strided_slice %36 {offsets = [0, 0, 0], sizes = [4, 8, 8], strides = [1, 1, 1]} : vector<4x16x8xf32> to vector<4x8x8xf32>
    %45 = arith.truncf %44 : vector<4x8x8xf32> to vector<4x8x8xbf16>
    "tpu.trace_start"() <{level = 10 : i32, message = "hqe,hke->hqk"}> : () -> ()
    %cst_7 = arith.constant dense<0.000000e+00> : vector<4x8x8xf32>
    %46 = tpu.matmul %41, %43, %cst_7 {dimension_numbers = #tpu.dot_dimension_numbers<[2], [2], [1], [1], [0, 0, 0, 1, 1, 1], [0], [0]>} : vector<4x8x8xbf16>, vector<4x8x8xbf16>, vector<4x8x8xf32> -> vector<4x8x8xf32>
    %cst_8 = arith.constant -1.000000e+30 : f32
    "tpu.trace_stop"() : () -> ()
    %47 = vector.shape_cast %39 : vector<8x8xi1> to vector<1x8x8xi1>
    %48 = vector.broadcast %47 : vector<1x8x8xi1> to vector<4x8x8xi1>
    %49 = vector.broadcast %cst_8 : f32 to vector<4x8x8xf32>
    %50 = arith.select %48, %46, %49 : vector<4x8x8xi1>, vector<4x8x8xf32>
    %cst_9 = arith.constant dense<0xFF800000> : vector<4x8xf32>
    %51 = vector.multi_reduction <maximumf>, %50, %cst_9 [2] : vector<4x8x8xf32> to vector<4x8xf32>
    %52 = vector.shape_cast %51 : vector<4x8xf32> to vector<4x8x1xf32>
    %53 = vector.broadcast %52 : vector<4x8x1xf32> to vector<4x8x8xf32>
    %54 = arith.subf %50, %53 : vector<4x8x8xf32>
    %55 = math.exp %54 : vector<4x8x8xf32>
    %cst_10 = arith.constant dense<0.000000e+00> : vector<4x8xf32>
    %56 = vector.multi_reduction <add>, %55, %cst_10 [2] : vector<4x8x8xf32> to vector<4x8xf32>
    %57 = vector.shape_cast %56 : vector<4x8xf32> to vector<4x8x1xf32>
    %58 = tpu.reciprocal %57 {approx = true} : vector<4x8x1xf32> -> vector<4x8x1xf32>
    %59 = vector.broadcast %58 : vector<4x8x1xf32> to vector<4x8x8xf32>
    %60 = arith.mulf %55, %59 : vector<4x8x8xf32>
    %61 = arith.truncf %60 : vector<4x8x8xf32> to vector<4x8x8xbf16>
    "tpu.trace_start"() <{level = 10 : i32, message = "hqk,hke->hqe"}> : () -> ()
    %cst_11 = arith.constant dense<0.000000e+00> : vector<4x8x8xf32>
    %62 = tpu.matmul %61, %45, %cst_11 {dimension_numbers = #tpu.dot_dimension_numbers<[2], [1], [1], [2], [0, 0, 0, 1, 1, 2], [0], [0]>} : vector<4x8x8xbf16>, vector<4x8x8xbf16>, vector<4x8x8xf32> -> vector<4x8x8xf32>
    "tpu.trace_stop"() : () -> ()
    %63 = vector.extract_strided_slice %62 {offsets = [0, 0, 0], sizes = [1, 8, 8], strides = [1, 1, 1]} : vector<4x8x8xf32> to vector<1x8x8xf32>
    %64 = vector.shape_cast %63 : vector<1x8x8xf32> to vector<8x8xf32>
    %65 = vector.extract_strided_slice %62 {offsets = [1, 0, 0], sizes = [1, 8, 8], strides = [1, 1, 1]} : vector<4x8x8xf32> to vector<1x8x8xf32>
    %66 = vector.shape_cast %65 : vector<1x8x8xf32> to vector<8x8xf32>
    %67 = vector.extract_strided_slice %62 {offsets = [2, 0, 0], sizes = [1, 8, 8], strides = [1, 1, 1]} : vector<4x8x8xf32> to vector<1x8x8xf32>
    %68 = vector.shape_cast %67 : vector<1x8x8xf32> to vector<8x8xf32>
    %69 = vector.extract_strided_slice %62 {offsets = [3, 0, 0], sizes = [1, 8, 8], strides = [1, 1, 1]} : vector<4x8x8xf32> to vector<1x8x8xf32>
    %70 = vector.shape_cast %69 : vector<1x8x8xf32> to vector<8x8xf32>
    %71 = tpu.concatenate %64, %66, %68, %70 in 1 : vector<8x8xf32>, vector<8x8xf32>, vector<8x8xf32>, vector<8x8xf32> -> vector<8x32xf32>
    %72 = vector.extract_strided_slice %18 {offsets = [0, 8, 0], sizes = [4, 8, 8], strides = [1, 1, 1]} : vector<4x16x8xf32> to vector<4x8x8xf32>
    %73 = arith.truncf %72 : vector<4x8x8xf32> to vector<4x8x8xbf16>
    %74 = vector.extract_strided_slice %27 {offsets = [0, 8, 0], sizes = [4, 8, 8], strides = [1, 1, 1]} : vector<4x16x8xf32> to vector<4x8x8xf32>
    %75 = arith.truncf %74 : vector<4x8x8xf32> to vector<4x8x8xbf16>
    %76 = vector.extract_strided_slice %36 {offsets = [0, 8, 0], sizes = [4, 8, 8], strides = [1, 1, 1]} : vector<4x16x8xf32> to vector<4x8x8xf32>
    %77 = arith.truncf %76 : vector<4x8x8xf32> to vector<4x8x8xbf16>
    "tpu.trace_start"() <{level = 10 : i32, message = "hqe,hke->hqk"}> : () -> ()
    %cst_12 = arith.constant dense<0.000000e+00> : vector<4x8x8xf32>
    %78 = tpu.matmul %73, %75, %cst_12 {dimension_numbers = #tpu.dot_dimension_numbers<[2], [2], [1], [1], [0, 0, 0, 1, 1, 1], [0], [0]>} : vector<4x8x8xbf16>, vector<4x8x8xbf16>, vector<4x8x8xf32> -> vector<4x8x8xf32>
    %cst_13 = arith.constant -1.000000e+30 : f32
    "tpu.trace_stop"() : () -> ()
    %79 = vector.shape_cast %39 : vector<8x8xi1> to vector<1x8x8xi1>
    %80 = vector.broadcast %79 : vector<1x8x8xi1> to vector<4x8x8xi1>
    %81 = vector.broadcast %cst_13 : f32 to vector<4x8x8xf32>
    %82 = arith.select %80, %78, %81 : vector<4x8x8xi1>, vector<4x8x8xf32>
    %cst_14 = arith.constant dense<0xFF800000> : vector<4x8xf32>
    %83 = vector.multi_reduction <maximumf>, %82, %cst_14 [2] : vector<4x8x8xf32> to vector<4x8xf32>
    %84 = vector.shape_cast %83 : vector<4x8xf32> to vector<4x8x1xf32>
    %85 = vector.broadcast %84 : vector<4x8x1xf32> to vector<4x8x8xf32>
    %86 = arith.subf %82, %85 : vector<4x8x8xf32>
    %87 = math.exp %86 : vector<4x8x8xf32>
    %cst_15 = arith.constant dense<0.000000e+00> : vector<4x8xf32>
    %88 = vector.multi_reduction <add>, %87, %cst_15 [2] : vector<4x8x8xf32> to vector<4x8xf32>
    %89 = vector.shape_cast %88 : vector<4x8xf32> to vector<4x8x1xf32>
    %90 = tpu.reciprocal %89 {approx = true} : vector<4x8x1xf32> -> vector<4x8x1xf32>
    %91 = vector.broadcast %90 : vector<4x8x1xf32> to vector<4x8x8xf32>
    %92 = arith.mulf %87, %91 : vector<4x8x8xf32>
    %93 = arith.truncf %92 : vector<4x8x8xf32> to vector<4x8x8xbf16>
    "tpu.trace_start"() <{level = 10 : i32, message = "hqk,hke->hqe"}> : () -> ()
    %cst_16 = arith.constant dense<0.000000e+00> : vector<4x8x8xf32>
    %94 = tpu.matmul %93, %77, %cst_16 {dimension_numbers = #tpu.dot_dimension_numbers<[2], [1], [1], [2], [0, 0, 0, 1, 1, 2], [0], [0]>} : vector<4x8x8xbf16>, vector<4x8x8xbf16>, vector<4x8x8xf32> -> vector<4x8x8xf32>
    "tpu.trace_stop"() : () -> ()
    %95 = vector.extract_strided_slice %94 {offsets = [0, 0, 0], sizes = [1, 8, 8], strides = [1, 1, 1]} : vector<4x8x8xf32> to vector<1x8x8xf32>
    %96 = vector.shape_cast %95 : vector<1x8x8xf32> to vector<8x8xf32>
    %97 = vector.extract_strided_slice %94 {offsets = [1, 0, 0], sizes = [1, 8, 8], strides = [1, 1, 1]} : vector<4x8x8xf32> to vector<1x8x8xf32>
    %98 = vector.shape_cast %97 : vector<1x8x8xf32> to vector<8x8xf32>
    %99 = vector.extract_strided_slice %94 {offsets = [2, 0, 0], sizes = [1, 8, 8], strides = [1, 1, 1]} : vector<4x8x8xf32> to vector<1x8x8xf32>
    %100 = vector.shape_cast %99 : vector<1x8x8xf32> to vector<8x8xf32>
    %101 = vector.extract_strided_slice %94 {offsets = [3, 0, 0], sizes = [1, 8, 8], strides = [1, 1, 1]} : vector<4x8x8xf32> to vector<1x8x8xf32>
    %102 = vector.shape_cast %101 : vector<1x8x8xf32> to vector<8x8xf32>
    %103 = tpu.concatenate %96, %98, %100, %102 in 1 : vector<8x8xf32>, vector<8x8xf32>, vector<8x8xf32>, vector<8x8xf32> -> vector<8x32xf32>
    %104 = tpu.concatenate %71, %103 in 0 : vector<8x32xf32>, vector<8x32xf32> -> vector<16x32xf32>
    %105 = arith.truncf %104 : vector<16x32xf32> to vector<16x32xbf16>
    %c0_17 = arith.constant 0 : index
    %c0_18 = arith.constant 0 : index
    %106 = vector.load %arg4[%c0_17, %c0_18] : memref<32x32xbf16, #tpu.memory_space<vmem>>, vector<32x32xbf16>
    %cst_19 = arith.constant dense<0.000000e+00> : vector<16x32xf32>
    %107 = tpu.matmul %105, %106, %cst_19 {dimension_numbers = #tpu.dot_dimension_numbers<[1], [0], [0], [1], [0, 0, 1, 1], [], []>} : vector<16x32xbf16>, vector<32x32xbf16>, vector<16x32xf32> -> vector<16x32xf32>
    %c0_20 = arith.constant 0 : index
    %c0_21 = arith.constant 0 : index
    %108 = vector.load %arg5[%c0_20, %c0_21] : memref<1x32xf32, #tpu.memory_space<vmem>>, vector<1x32xf32>
    %109 = vector.broadcast %108 : vector<1x32xf32> to vector<16x32xf32>
    %110 = arith.addf %107, %109 : vector<16x32xf32>
    %111 = arith.addf %1, %110 : vector<16x32xf32>
    %c0_22 = arith.constant 0 : index
    %c0_23 = arith.constant 0 : index
    %112 = vector.load %arg6[%c0_22, %c0_23] : memref<1x32xf32, #tpu.memory_space<vmem>>, vector<1x32xf32>
    %113 = vector.broadcast %112 : vector<1x32xf32> to vector<16x32xf32>
    %114 = arith.mulf %111, %113 : vector<16x32xf32>
    %c0_24 = arith.constant 0 : index
    %c0_25 = arith.constant 0 : index
    %115 = vector.load %arg7[%c0_24, %c0_25] : memref<1x32xf32, #tpu.memory_space<vmem>>, vector<1x32xf32>
    %116 = vector.broadcast %115 : vector<1x32xf32> to vector<16x32xf32>
    %117 = arith.addf %114, %116 : vector<16x32xf32>
    %118 = arith.truncf %111 : vector<16x32xf32> to vector<16x32xbf16>
    %c0_26 = arith.constant 0 : index
    %c0_27 = arith.constant 0 : index
    %119 = vector.load %arg8[%c0_26, %c0_27] : memref<32x128xbf16, #tpu.memory_space<vmem>>, vector<32x128xbf16>
    %cst_28 = arith.constant dense<0.000000e+00> : vector<16x128xf32>
    %120 = tpu.matmul %118, %119, %cst_28 {dimension_numbers = #tpu.dot_dimension_numbers<[1], [0], [0], [1], [0, 0, 1, 1], [], []>} : vector<16x32xbf16>, vector<32x128xbf16>, vector<16x128xf32> -> vector<16x128xf32>
    %c0_29 = arith.constant 0 : index
    %c0_30 = arith.constant 0 : index
    %121 = vector.load %arg9[%c0_29, %c0_30] : memref<1x128xf32, #tpu.memory_space<vmem>>, vector<1x128xf32>
    %122 = vector.broadcast %121 : vector<1x128xf32> to vector<16x128xf32>
    %123 = arith.addf %120, %122 : vector<16x128xf32>
    %cst_31 = arith.constant 0.707106769 : f32
    %124 = vector.broadcast %cst_31 : f32 to vector<16x128xf32>
    %125 = arith.mulf %123, %124 : vector<16x128xf32>
    %126 = math.absf %125 : vector<16x128xf32>
    %cst_32 = arith.constant 0.327591091 : f32
    %127 = vector.broadcast %cst_32 : f32 to vector<16x128xf32>
    %128 = arith.mulf %127, %126 : vector<16x128xf32>
    %cst_33 = arith.constant 1.000000e+00 : f32
    %129 = vector.broadcast %cst_33 : f32 to vector<16x128xf32>
    %130 = arith.addf %129, %128 : vector<16x128xf32>
    %131 = tpu.reciprocal %130 {approx = true} : vector<16x128xf32> -> vector<16x128xf32>
    %cst_34 = arith.constant 1.06140542 : f32
    %132 = vector.broadcast %cst_34 : f32 to vector<16x128xf32>
    %133 = arith.mulf %132, %131 : vector<16x128xf32>
    %cst_35 = arith.constant -1.45315206 : f32
    %134 = vector.broadcast %cst_35 : f32 to vector<16x128xf32>
    %135 = arith.addf %133, %134 : vector<16x128xf32>
    %136 = arith.mulf %135, %131 : vector<16x128xf32>
    %cst_36 = arith.constant 1.42141378 : f32
    %137 = vector.broadcast %cst_36 : f32 to vector<16x128xf32>
    %138 = arith.addf %136, %137 : vector<16x128xf32>
    %139 = arith.mulf %138, %131 : vector<16x128xf32>
    %cst_37 = arith.constant -0.284496725 : f32
    %140 = vector.broadcast %cst_37 : f32 to vector<16x128xf32>
    %141 = arith.addf %139, %140 : vector<16x128xf32>
    %142 = arith.mulf %141, %131 : vector<16x128xf32>
    %cst_38 = arith.constant 0.254829586 : f32
    %143 = vector.broadcast %cst_38 : f32 to vector<16x128xf32>
    %144 = arith.addf %142, %143 : vector<16x128xf32>
    %145 = arith.mulf %144, %131 : vector<16x128xf32>
    %cst_39 = arith.constant 0.000000e+00 : f32
    %146 = vector.broadcast %cst_39 : f32 to vector<16x128xf32>
    %147 = arith.subf %146, %126 : vector<16x128xf32>
    %148 = arith.mulf %147, %126 : vector<16x128xf32>
    %149 = math.exp %148 : vector<16x128xf32>
    %150 = arith.mulf %145, %149 : vector<16x128xf32>
    %cst_40 = arith.constant 1.000000e+00 : f32
    %151 = vector.broadcast %cst_40 : f32 to vector<16x128xf32>
    %152 = arith.subf %151, %150 : vector<16x128xf32>
    %cst_41 = arith.constant 0.000000e+00 : f32
    %153 = vector.broadcast %cst_41 : f32 to vector<16x128xf32>
    %154 = arith.cmpf oge, %125, %153 : vector<16x128xf32>
    %cst_42 = arith.constant 0.000000e+00 : f32
    %155 = vector.broadcast %cst_42 : f32 to vector<16x128xf32>
    %156 = arith.subf %155, %152 : vector<16x128xf32>
    %157 = arith.select %154, %152, %156 : vector<16x128xi1>, vector<16x128xf32>
    %cst_43 = arith.constant 5.000000e-01 : f32
    %158 = vector.broadcast %cst_43 : f32 to vector<16x128xf32>
    %159 = arith.mulf %158, %123 : vector<16x128xf32>
    %cst_44 = arith.constant 1.000000e+00 : f32
    %160 = vector.broadcast %cst_44 : f32 to vector<16x128xf32>
    %161 = arith.addf %160, %157 : vector<16x128xf32>
    %162 = arith.mulf %159, %161 : vector<16x128xf32>
    %163 = arith.truncf %162 : vector<16x128xf32> to vector<16x128xbf16>
    %c0_45 = arith.constant 0 : index
    %c0_46 = arith.constant 0 : index
    %164 = vector.load %arg10[%c0_45, %c0_46] : memref<128x32xbf16, #tpu.memory_space<vmem>>, vector<128x32xbf16>
    %cst_47 = arith.constant dense<0.000000e+00> : vector<16x32xf32>
    %165 = tpu.matmul %163, %164, %cst_47 {dimension_numbers = #tpu.dot_dimension_numbers<[1], [0], [0], [1], [0, 0, 1, 1], [], []>} : vector<16x128xbf16>, vector<128x32xbf16>, vector<16x32xf32> -> vector<16x32xf32>
    %c0_48 = arith.constant 0 : index
    %c0_49 = arith.constant 0 : index
    %166 = vector.load %arg11[%c0_48, %c0_49] : memref<1x32xf32, #tpu.memory_space<vmem>>, vector<1x32xf32>
    %167 = vector.broadcast %166 : vector<1x32xf32> to vector<16x32xf32>
    %168 = arith.addf %165, %167 : vector<16x32xf32>
    %169 = arith.addf %168, %117 : vector<16x32xf32>
    %c0_50 = arith.constant 0 : index
    %c0_51 = arith.constant 0 : index
    %170 = vector.load %arg12[%c0_50, %c0_51] : memref<1x32xf32, #tpu.memory_space<vmem>>, vector<1x32xf32>
    %171 = vector.broadcast %170 : vector<1x32xf32> to vector<16x32xf32>
    %172 = arith.mulf %169, %171 : vector<16x32xf32>
    %c0_52 = arith.constant 0 : index
    %c0_53 = arith.constant 0 : index
    %173 = vector.load %arg13[%c0_52, %c0_53] : memref<1x32xf32, #tpu.memory_space<vmem>>, vector<1x32xf32>
    %174 = vector.broadcast %173 : vector<1x32xf32> to vector<16x32xf32>
    %175 = arith.addf %172, %174 : vector<16x32xf32>
    %176 = vector.shape_cast %175 : vector<16x32xf32> to vector<2x8x32xf32>
    %c0_54 = arith.constant 0 : index
    %c0_55 = arith.constant 0 : index
    %c0_56 = arith.constant 0 : index
    %177 = vector.load %arg14[%c0_54, %c0_55, %c0_56] : memref<2x8x32xf32, #tpu.memory_space<vmem>>, vector<2x8x32xf32>
    tpu.vector_store %arg14[%c0_54, %c0_55, %c0_56], %176 {strides = array<i32>} : memref<2x8x32xf32, #tpu.memory_space<vmem>>, vector<2x8x32xf32>,
    return
  }
  func.func @transform_0(%arg0: i32) -> (i32, i32, i32) {
    %c0_i32 = arith.constant 0 : i32
    %c0_i32_0 = arith.constant 0 : i32
    %c0_i32_1 = arith.constant 0 : i32
    return %arg0, %c0_i32, %c0_i32_0 : i32, i32, i32
  }
  func.func @transform_1(%arg0: i32) -> (i32, i32) {
    %c0_i32 = arith.constant 0 : i32
    %c0_i32_0 = arith.constant 0 : i32
    %c0_i32_1 = arith.constant 0 : i32
    return %c0_i32, %c0_i32_0 : i32, i32
  }
  func.func @transform_2(%arg0: i32) -> (i32, i32) {
    %c0_i32 = arith.constant 0 : i32
    %c0_i32_0 = arith.constant 0 : i32
    %c0_i32_1 = arith.constant 0 : i32
    return %c0_i32, %c0_i32_0 : i32, i32
  }
  func.func @transform_3(%arg0: i32) -> (i32, i32) {
    %c0_i32 = arith.constant 0 : i32
    %c0_i32_0 = arith.constant 0 : i32
    %c0_i32_1 = arith.constant 0 : i32
    return %c0_i32, %c0_i32_0 : i32, i32
  }
  func.func @transform_4(%arg0: i32) -> (i32, i32) {
    %c0_i32 = arith.constant 0 : i32
    %c0_i32_0 = arith.constant 0 : i32
    %c0_i32_1 = arith.constant 0 : i32
    return %c0_i32, %c0_i32_0 : i32, i32
  }
  func.func @transform_5(%arg0: i32) -> (i32, i32) {
    %c0_i32 = arith.constant 0 : i32
    %c0_i32_0 = arith.constant 0 : i32
    %c0_i32_1 = arith.constant 0 : i32
    return %c0_i32, %c0_i32_0 : i32, i32
  }
  func.func @transform_6(%arg0: i32) -> (i32, i32) {
    %c0_i32 = arith.constant 0 : i32
    %c0_i32_0 = arith.constant 0 : i32
    %c0_i32_1 = arith.constant 0 : i32
    return %c0_i32, %c0_i32_0 : i32, i32
  }
  func.func @transform_7(%arg0: i32) -> (i32, i32) {
    %c0_i32 = arith.constant 0 : i32
    %c0_i32_0 = arith.constant 0 : i32
    %c0_i32_1 = arith.constant 0 : i32
    return %c0_i32, %c0_i32_0 : i32, i32
  }
  func.func @transform_8(%arg0: i32) -> (i32, i32) {
    %c0_i32 = arith.constant 0 : i32
    %c0_i32_0 = arith.constant 0 : i32
    %c0_i32_1 = arith.constant 0 : i32
    return %c0_i32, %c0_i32_0 : i32, i32
  }
  func.func @transform_9(%arg0: i32) -> (i32, i32) {
    %c0_i32 = arith.constant 0 : i32
    %c0_i32_0 = arith.constant 0 : i32
    %c0_i32_1 = arith.constant 0 : i32
    return %c0_i32, %c0_i32_0 : i32, i32
  }
  func.func @transform_10(%arg0: i32) -> (i32, i32) {
    %c0_i32 = arith.constant 0 : i32
    %c0_i32_0 = arith.constant 0 : i32
    %c0_i32_1 = arith.constant 0 : i32
    return %c0_i32, %c0_i32_0 : i32, i32
  }
  func.func @transform_11(%arg0: i32) -> (i32, i32) {
    %c0_i32 = arith.constant 0 : i32
    %c0_i32_0 = arith.constant 0 : i32
    %c0_i32_1 = arith.constant 0 : i32
    return %c0_i32, %c0_i32_0 : i32, i32
  }
  func.func @transform_12(%arg0: i32) -> (i32, i32) {
    %c0_i32 = arith.constant 0 : i32
    %c0_i32_0 = arith.constant 0 : i32
    %c0_i32_1 = arith.constant 0 : i32
    return %c0_i32, %c0_i32_0 : i32, i32
  }
  func.func @transform_13(%arg0: i32) -> (i32, i32, i32) {
    %c0_i32 = arith.constant 0 : i32
    %c0_i32_0 = arith.constant 0 : i32
    %c0_i32_1 = arith.constant 0 : i32
    return %arg0, %c0_i32, %c0_i32_0 : i32, i32, i32
  }
}

</mosaic_0001>

<bundles_post_ra>
// kernel: tpu_custom_call.1
= control target key start
LH: loop header
LB: loop body
LE: loop exit
PB: predicated region body
PF: predicated region fallthrough
CT: control target
= control target key end

     0   :  { %v1777_v1 = vmov 0.0   ;;  %vm1778_vm0 = vmmov 0   ;;  %vm72_vm1 = vcmask 261120   ;;  %s2195_s0 = inlined_call_operand.vmem [shape: f32[2,8,32], index: 0, kind: input, shape index: {}]   ;;  %s2196_s1 = inlined_call_operand.vmem [shape: bf16[32,96], index: 1, kind: input, shape index: {}]   ;;  %s2197_s2 = inlined_call_operand.vmem [shape: f32[1,96], index: 2, kind: input, shape index: {}]   ;;  %s2198_s3 = inlined_call_operand.vmem [shape: bf16[32,32], index: 3, kind: input, shape index: {}]   ;;  %s2199_s4 = inlined_call_operand.vmem [shape: f32[1,32], index: 4, kind: input, shape index: {}]   ;;  %s2200_s5 = inlined_call_operand.vmem [shape: f32[1,32], index: 5, kind: input, shape index: {}]   ;;  %s2201_s6 = inlined_call_operand.vmem [shape: f32[1,32], index: 6, kind: input, shape index: {}]   ;;  %s2202_s7 = inlined_call_operand.vmem [shape: bf16[32,128], index: 7, kind: input, shape index: {}]   ;;  %s2203_s8 = inlined_call_operand.vmem [shape: f32[1,128], index: 8, kind: input, shape index: {}]   ;;  %s2204_s9 = inlined_call_operand.vmem [shape: bf16[128,32], index: 9, kind: input, shape index: {}]   ;;  %s2205_s10 = inlined_call_operand.vmem [shape: f32[1,32], index: 10, kind: input, shape index: {}]   ;;  %s2206_s11 = inlined_call_operand.vmem [shape: f32[1,32], index: 11, kind: input, shape index: {}]   ;;  %s2207_s12 = inlined_call_operand.vmem [shape: f32[1,32], index: 12, kind: input, shape index: {}]   ;;  %s2208_s13 = inlined_call_operand.hbm [shape: f32[2,8,32], index: 13, kind: output, shape index: {}]  }
   0x1   :  { %v1699_v0 = vld [vmem:[%s2196_s1] sm:$0xff]   ;;  %1532 = vmatprep.subr.bf16.mxu0 %v1777_v1  ;;  %1552 = vmatprep.subr.bf16.mxu1 %v1777_v1  ;;  %v1700_v2 = vld [vmem:[%s2196_s1 + $0x8] sm:$0xff]  }
   0x2   :  { %1533 = vmatpush3.bf16.msra.mxu0 %v1699_v0  ;;  %1536 = vmatprep.mubr.msk.bf16.mxu0 %vm1778_vm0, %v1777_v1  ;;  %v1872_v3 = vld [vmem:[%s2195_s0] sm:$0xff]  ;;  %v1877_v4 = vld [vmem:[%s2195_s0 + $0x8] sm:$0xff] }
   0x3   :  { %1534 = vmatprep.subr.bf16.mxu0 %v1777_v1  ;;  %1554 = vmatprep.mubr.msk.bf16.mxu1 %vm1778_vm0, %v1777_v1  ;;  %v48_v5 = vpack.c.bf16 %v1877_v4, %v1872_v3 }
   0x6   :  { %1535 = vmatpush3.bf16.msra.mxu0 %v1700_v2 }
   0x7   :  { %1540 = vmatprep.subr.bf16.mxu0 %v1777_v1 }
   0x9   :  { %1537 = vmatmul.mubr.msk.bf16.vlgmr.msra.gmra.mrb[0].mxu0 %vm72_vm1, %v48_v5 }
   0xa   :  { %1542 = vmatprep.mubr.msk.bf16.mxu0 %vm1778_vm0, %v1777_v1 }
   0xb   :  { %18 = vsyncpa [#allocation3], 0  ;;  %v1441_v6 = vld [vmem:[%s2197_s2] ss:$0 sm:$0xff]  ;;  %s1779_s16 = smov 104   ;;  %s1780_s17 = smov 120   ;;  %v145_v36 = vlaneseq }
   0xc   :  { %s1781_s18 = smov 112   ;;  %s1782_s19 = smov 96   ;;  %vm161_vm2 = vcmask 64512   ;;  %vm414_vm4 = vcmask 1043456   ;;  %vm615_vm5 = vcmask 130048   ;;  %vm617_vm6 = vcmask 195584  }
   0xd   :  { %v146_v37 = vshrl.u32 %v145_v36, 7  ;;  %v148_v38 = vand.u32 127, %v145_v36  ;;  %s1783_s2 = smov 64   ;;  %s1784_s24 = smov 8  }
   0xe   :  { %s1785_s25 = smov 16  }
   0xf   :  { %vm1932_vm3 = vcmp.le.s32.totalorder %v148_v38, %v146_v37 }
  0xdc   :  { %v110_v7 = vpop.f32.mrb[0].mxu0 }
  0xdd   :  { %v111_v8 = vadd.f32 %v1441_v6, %v110_v7  ;;  %v1538_v9 = vpop.f32.mrb[1].mxu0 }
  0xde   :  { %v113_v10 = vpop.f32.mrb[2].mxu0 }
  0xdf   :  { %v1891_v11 = vadd.f32 %v1441_v6, %v113_v10  ;;  %131 = vrot.lane.b32.xlu1 %v111_v8, %s1779_s16  ;;  %119 = vrot.lane.b32.xlu0 %v111_v8, %s1780_s17  ;;  %v1539_v12 = vpop.f32.mrb[3].mxu0  ;;  %v1895_v13 = vpack.c.bf16 %v111_v8, %v111_v8  ;;  %v137_v22 = vmul.f32 0.35355338, %v111_v8 }
  0xe1   :  { %v150_v23 = vpack.c.bf16 %v137_v22, %v137_v22 }
  0xe3   :  { %125 = vrot.lane.b32.xlu0 %v111_v8, %s1781_s18  ;;  %159 = vrot.lane.b32.xlu1 %v1895_v13, %s1782_s19 }
 0x151   :  { %v132_v14 = vpop.permute.xlu1 %131  ;;  %v120_v15 = vpop.permute.xlu0 %119 }
 0x152   :  { %v1900_v16 = vpack.c.bf16 %v120_v15, %v120_v15  ;;  %v1904_v19 = vpack.c.bf16 %v132_v14, %v132_v14  ;;  %v139_v26 = vmul.f32 0.35355338, %v120_v15  ;;  %v143_v33 = vmul.f32 0.35355338, %v132_v14 }
 0x154   :  { %209 = vrot.lane.b32.xlu0 %v1900_v16, %s1782_s19  ;;  %v151_v30 = vpack.c.bf16 %v139_v26, %v139_v26  ;;  %v153_v35 = vpack.c.bf16 %v143_v33, %v143_v33 }
 0x155   :  { %v126_v17 = vpop.permute.xlu0 %125  ;;  %v160_v18 = vpop.permute.xlu1 %159 }
 0x156   :  { %v1906_v20 = vpack.c.bf16 %v126_v17, %v126_v17  ;;  %v166_v21 = vsel %vm161_vm2, %v160_v18, 0  ;;  %v141_v31 = vmul.f32 0.35355338, %v126_v17 }
 0x157   :  { %1541 = vmatpush3.bf16.xpose.msra.mxu0 %v166_v21 }
 0x158   :  { %307 = vrot.lane.b32.xlu0 %v1904_v19, %s1782_s19  ;;  %258 = vrot.lane.b32.xlu1 %v1906_v20, %s1782_s19  ;;  %v152_v34 = vpack.c.bf16 %v141_v31, %v141_v31 }
 0x159   :  { %1546 = vmatprep.subr.bf16.mxu0 %v1777_v1 }
 0x15e   :  { %1543 = vmatmul.mubr.msk.bf16.vlgmr.msra.gmra.mrb[4].mxu0 %vm161_vm2, %v150_v23 }
 0x15f   :  { %1548 = vmatprep.mubr.msk.bf16.mxu0 %vm1778_vm0, %v1777_v1 }
 0x1c6   :  { %v210_v24 = vpop.permute.xlu0 %209 }
 0x1c7   :  { %v215_v25 = vsel %vm161_vm2, %v210_v24, 0 }
 0x1c8   :  { %1547 = vmatpush3.bf16.xpose.msra.mxu0 %v215_v25 }
 0x1c9   :  { %1558 = vmatprep.subr.bf16.mxu0 %v1777_v1 }
 0x1ca   :  { %v259_v27 = vpop.permute.xlu1 %258  ;;  %v308_v29 = vpop.permute.xlu0 %307 }
 0x1cb   :  { %v264_v28 = vsel %vm161_vm2, %v259_v27, 0  ;;  %v313_v32 = vsel %vm161_vm2, %v308_v29, 0 }
 0x1cc   :  { %1553 = vmatpush3.bf16.xpose.msra.mxu1 %v264_v28 }
 0x1cd   :  { %1564 = vmatprep.subr.bf16.mxu1 %v1777_v1 }
 0x1cf   :  { %1549 = vmatmul.mubr.msk.bf16.vlgmr.msra.gmra.mrb[8].mxu0 %vm161_vm2, %v151_v30 }
 0x1d0   :  { %1559 = vmatpush3.bf16.xpose.msra.mxu0 %v313_v32  ;;  %1560 = vmatprep.mubr.msk.bf16.mxu0 %vm1778_vm0, %v1777_v1 }
 0x1d1   :  { %1570 = vmatprep.subr.bf16.mxu0 %v1777_v1 }
 0x1d3   :  { %1555 = vmatmul.mubr.msk.bf16.vlgmr.msra.gmra.mrb[0].mxu1 %vm161_vm2, %v152_v34  ;;  %v1990_v34 = vpack.c.bf16 %v1891_v11, %v1891_v11 }
 0x1d4   :  { %1566 = vmatprep.mubr.msk.bf16.mxu1 %vm1778_vm0, %v1777_v1 }
 0x1d7   :  { %1561 = vmatmul.mubr.msk.bf16.vlgmr.msra.gmra.mrb[12].mxu0 %vm161_vm2, %v153_v35 }
 0x1d8   :  { %1572 = vmatprep.mubr.msk.bf16.mxu0 %vm1778_vm0, %v1777_v1 }
 0x231   :  { %v202_v40 = vpop.f32.mrb[4].mxu0 }
 0x232   :  { %v357_v41 = vsel %vm1932_vm3, %v202_v40, -1e+30  ;;  %v1544_v42 = vpop.f32.mrb[5].mxu0 }
 0x233   :  { %v205_v43 = vpop.f32.mrb[6].mxu0  ;;  %v361_v44 = vsel %vm161_vm2, %v357_v41, -inf }
 0x234   :  { %362 = vmax.xlane.f32.xlu1 %v361_v44  ;;  %v1545_v45 = vpop.f32.mrb[7].mxu0 }
 0x2a2   :  { %v251_v46 = vpop.f32.mrb[8].mxu0 }
 0x2a3   :  { %v358_v47 = vsel %vm1932_vm3, %v251_v46, -1e+30  ;;  %v1550_v48 = vpop.f32.mrb[9].mxu0 }
 0x2a4   :  { %v254_v49 = vpop.f32.mrb[10].mxu0  ;;  %v364_v50 = vsel %vm161_vm2, %v358_v47, -inf }
 0x2a5   :  { %365 = vmax.xlane.f32.xlu0 %v364_v50  ;;  %v1551_v51 = vpop.f32.mrb[11].mxu0 }
 0x2a6   :  { %v300_v52 = vpop.f32.mrb[0].mxu1 }
 0x2a7   :  { %v359_v53 = vsel %vm1932_vm3, %v300_v52, -1e+30  ;;  %v1556_v54 = vpop.f32.mrb[1].mxu1 }
 0x2a8   :  { %v303_v55 = vpop.f32.mrb[2].mxu1  ;;  %v367_v56 = vsel %vm161_vm2, %v359_v53, -inf }
 0x2a9   :  { %v1557_v57 = vpop.f32.mrb[3].mxu1  ;;  %368 = vmax.xlane.f32.xlu0 %v367_v56 }
 0x2aa   :  { %v349_v58 = vpop.f32.mrb[12].mxu0 }
 0x2ab   :  { %v360_v59 = vsel %vm1932_vm3, %v349_v58, -1e+30  ;;  %v1562_v60 = vpop.f32.mrb[13].mxu0 }
 0x2ac   :  { %v352_v61 = vpop.f32.mrb[14].mxu0  ;;  %v370_v62 = vsel %vm161_vm2, %v360_v59, -inf }
 0x2ad   :  { %371 = vmax.xlane.f32.xlu1 %v370_v62  ;;  %v1563_v63 = vpop.f32.mrb[15].mxu0 }
 0x2be   :  { %127 = vrot.lane.b32.xlu1 %v1891_v11, %s1781_s18 }
 0x2bf   :  { %121 = vrot.lane.b32.xlu0 %v1891_v11, %s1780_s17 }
 0x2c1   :  { %v363_v0 = vpop.xlane.xlu1 %362 }
 0x2c2   :  { %133 = vrot.lane.b32.xlu1 %v1891_v11, %s1779_s16  ;;  %v373_v2 = vsub.f32 %v357_v41, %v363_v0 }
 0x2c3   :  { %458 = vrot.lane.b32.xlu0 %v1900_v16, %s1783_s2 }
 0x2c4   :  { %v377_v5 = vmul.f32 1.442695, %v373_v2 }
 0x2c6   :  { %409 = vrot.lane.b32.xlu1 %v1895_v13, %s1783_s2  ;;  %1713 = vpow2.f32 %v377_v5 }
 0x2ca   :  { %506 = vrot.lane.b32.xlu1 %v1906_v20, %s1783_s2 }
 0x2d0   :  { %v1714_v6 = vpop.eup %1713 }
 0x2d1   :  { %v385_v7 = vsel %vm161_vm2, %v1714_v6, 0.0 }
 0x2e2   :  { %386 = vadd.xlane.f32.xlu0 %v385_v7 }
 0x332   :  { %v366_v8 = vpop.xlane.xlu0 %365 }
 0x333   :  { %v374_v9 = vsub.f32 %v358_v47, %v366_v8 }
 0x335   :  { %v379_v10 = vmul.f32 1.442695, %v374_v9 }
 0x336   :  { %v369_v12 = vpop.xlane.xlu0 %368 }
 0x337   :  { %1715 = vpow2.f32 %v379_v10  ;;  %v375_v14 = vsub.f32 %v359_v53, %v369_v12 }
 0x339   :  { %v381_v15 = vmul.f32 1.442695, %v375_v14 }
 0x33a   :  { %v1961_v16 = vpop.permute.xlu0 %121  ;;  %v372_v13 = vpop.xlane.xlu1 %371 }
 0x33b   :  { %1717 = vpow2.f32 %v381_v15  ;;  %v376_v17 = vsub.f32 %v360_v59, %v372_v13  ;;  %v1978_v32 = vpack.c.bf16 %v1961_v16, %v1961_v16  ;;  %v138_v59 = vmul.f32 0.35355338, %v1891_v11 }
 0x33c   :  { %v140_v63 = vmul.f32 0.35355338, %v1961_v16 }
 0x33d   :  { %v383_v18 = vmul.f32 1.442695, %v376_v17  ;;  %v619_v62 = vpack.c.bf16 %v138_v59, %v138_v59 }
 0x33e   :  { %v459_v20 = vpop.permute.xlu0 %458  ;;  %v1963_v21 = vpop.permute.xlu1 %127  ;;  %v620_v5 = vpack.c.bf16 %v140_v63, %v140_v63 }
 0x33f   :  { %1719 = vpow2.f32 %v383_v18  ;;  %v464_v22 = vsel %vm414_vm4, %v459_v20, 0  ;;  %v142_v11 = vmul.f32 0.35355338, %v1963_v21 }
 0x340   :  { %1571 = vmatpush3.bf16.msra.mxu0 %v464_v22 }
 0x341   :  { %v1716_v23 = vpop.eup %1715  ;;  %1582 = vmatprep.subr.bf16.mxu0 %v1777_v1  ;;  %v621_v7 = vpack.c.bf16 %v142_v11, %v142_v11 }
 0x342   :  { %v1967_v24 = vpop.permute.xlu1 %133  ;;  %v388_v25 = vsel %vm161_vm2, %v1716_v23, 0.0 }
 0x343   :  { %389 = vadd.xlane.f32.xlu1 %v388_v25  ;;  %v1984_v33 = vpack.c.bf16 %v1967_v24, %v1967_v24  ;;  %v144_v8 = vmul.f32 0.35355338, %v1967_v24 }
 0x345   :  { %v1718_v26 = vpop.eup %1717  ;;  %v622_v9 = vpack.c.bf16 %v144_v8, %v144_v8 }
 0x346   :  { %v410_v27 = vpop.permute.xlu1 %409  ;;  %v391_v28 = vsel %vm161_vm2, %v1718_v26, 0.0 }
 0x347   :  { %v416_v29 = vsel %vm414_vm4, %v410_v27, 0  ;;  %392 = vadd.xlane.f32.xlu0 %v391_v28 }
 0x348   :  { %1565 = vmatpush3.bf16.msra.mxu1 %v416_v29 }
 0x349   :  { %v1720_v30 = vpop.eup %1719  ;;  %1576 = vmatprep.subr.bf16.mxu1 %v1777_v1 }
 0x34a   :  { %v394_v31 = vsel %vm161_vm2, %v1720_v30, 0.0  ;;  %v507_v38 = vpop.permute.xlu1 %506 }
 0x34b   :  { %395 = vadd.xlane.f32.xlu0 %v394_v31  ;;  %v512_v41 = vsel %vm414_vm4, %v507_v38, 0 }
 0x354   :  { %554 = vrot.lane.b32.xlu1 %v1904_v19, %s1783_s2  ;;  %v1996_v19 = vpack.c.bf16 %v1963_v21, %v1963_v21 }
 0x358   :  { %677 = vrot.lane.b32.xlu1 %v1978_v32, %s1782_s19 }
 0x35c   :  { %775 = vrot.lane.b32.xlu1 %v1984_v33, %s1782_s19 }
 0x361   :  { %628 = vrot.lane.b32.xlu0 %v1990_v34, %s1782_s19 }
 0x365   :  { %726 = vrot.lane.b32.xlu0 %v1996_v19, %s1782_s19 }
 0x36f   :  { %v387_v35 = vpop.xlane.xlu0 %386 }
 0x370   :  { %1721 = vrcp.f32 %v387_v35 }
 0x37a   :  { %v1722_v36 = vpop.eup %1721 }
 0x37b   :  { %v401_v37 = vmul.f32 %v1722_v36, %v1714_v6 }
 0x37d   :  { %v405_v40 = vpack.c.bf16 %v401_v37, %v401_v37 }
 0x37f   :  { %1567 = vmatmul.mubr.msk.bf16.vlgmr.msra.gmra.mrb[4].mxu1 %vm161_vm2, %v405_v40 }
 0x380   :  { %1577 = vmatpush3.bf16.msra.mxu1 %v512_v41  ;;  %1578 = vmatprep.mubr.msk.bf16.mxu1 %vm1778_vm0, %v1777_v1 }
 0x381   :  { %1588 = vmatprep.subr.bf16.mxu1 %v1777_v1 }
 0x3d0   :  { %v390_v42 = vpop.xlane.xlu1 %389 }
 0x3d1   :  { %1723 = vrcp.f32 %v390_v42 }
 0x3d4   :  { %v393_v43 = vpop.xlane.xlu0 %392  ;;  %v555_v47 = vpop.permute.xlu1 %554 }
 0x3d5   :  { %1725 = vrcp.f32 %v393_v43  ;;  %v560_v51 = vsel %vm414_vm4, %v555_v47, 0 }
 0x3d8   :  { %v396_v44 = vpop.xlane.xlu0 %395  ;;  %v678_v57 = vpop.permute.xlu1 %677 }
 0x3d9   :  { %1727 = vrcp.f32 %v396_v44  ;;  %v683_v60 = vsel %vm161_vm2, %v678_v57, 0 }
 0x3db   :  { %v1724_v45 = vpop.eup %1723 }
 0x3dc   :  { %v402_v46 = vmul.f32 %v1724_v45, %v1716_v23  ;;  %v629_v52 = vpop.permute.xlu0 %628  ;;  %v776_v2 = vpop.permute.xlu1 %775 }
 0x3dd   :  { %v634_v56 = vsel %vm161_vm2, %v629_v52, 0  ;;  %v781_v6 = vsel %vm161_vm2, %v776_v2, 0 }
 0x3de   :  { %v406_v48 = vpack.c.bf16 %v402_v46, %v402_v46 }
 0x3df   :  { %v1726_v49 = vpop.eup %1725 }
 0x3e0   :  { %v403_v50 = vmul.f32 %v1726_v49, %v1718_v26  ;;  %1573 = vmatmul.mubr.msk.bf16.vlgmr.msra.gmra.mrb[16].mxu0 %vm161_vm2, %v406_v48  ;;  %v727_v61 = vpop.permute.xlu0 %726 }
 0x3e1   :  { %1583 = vmatpush3.bf16.msra.mxu0 %v560_v51  ;;  %1584 = vmatprep.mubr.msk.bf16.mxu0 %vm1778_vm0, %v1777_v1  ;;  %v732_v0 = vsel %vm161_vm2, %v727_v61, 0 }
 0x3e2   :  { %v407_v53 = vpack.c.bf16 %v403_v50, %v403_v50  ;;  %1594 = vmatprep.subr.bf16.mxu0 %v1777_v1 }
 0x3e3   :  { %v1728_v54 = vpop.eup %1727 }
 0x3e4   :  { %v404_v55 = vmul.f32 %v1728_v54, %v1720_v30  ;;  %1579 = vmatmul.mubr.msk.bf16.vlgmr.msra.gmra.mrb[8].mxu1 %vm161_vm2, %v407_v53 }
 0x3e5   :  { %1589 = vmatpush3.bf16.xpose.msra.mxu1 %v634_v56  ;;  %1590 = vmatprep.mubr.msk.bf16.mxu1 %vm1778_vm0, %v1777_v1 }
 0x3e6   :  { %v408_v58 = vpack.c.bf16 %v404_v55, %v404_v55  ;;  %1600 = vmatprep.subr.bf16.mxu1 %v1777_v1 }
 0x3e8   :  { %1585 = vmatmul.mubr.msk.bf16.vlgmr.msra.gmra.mrb[20].mxu0 %vm161_vm2, %v408_v58 }
 0x3e9   :  { %1596 = vmatprep.mubr.msk.bf16.mxu0 %vm1778_vm0, %v1777_v1 }
 0x3ea   :  { %1595 = vmatpush3.bf16.xpose.msra.mxu0 %v683_v60 }
 0x3eb   :  { %1606 = vmatprep.subr.bf16.mxu0 %v1777_v1 }
 0x3ec   :  { %1591 = vmatmul.mubr.msk.bf16.vlgmr.msra.gmra.mrb[12].mxu1 %vm161_vm2, %v619_v62 }
 0x3ed   :  { %1601 = vmatpush3.bf16.xpose.msra.mxu1 %v732_v0  ;;  %1602 = vmatprep.mubr.msk.bf16.mxu1 %vm1778_vm0, %v1777_v1 }
 0x3ee   :  { %1612 = vmatprep.subr.bf16.mxu1 %v1777_v1 }
 0x3f1   :  { %1597 = vmatmul.mubr.msk.bf16.vlgmr.msra.gmra.mrb[24].mxu0 %vm161_vm2, %v620_v5 }
 0x3f2   :  { %1607 = vmatpush3.bf16.xpose.msra.mxu0 %v781_v6  ;;  %1608 = vmatprep.mubr.msk.bf16.mxu0 %vm1778_vm0, %v1777_v1 }
 0x3f3   :  { %1618 = vmatprep.subr.bf16.mxu0 %v1777_v1 }
 0x3f4   :  { %1603 = vmatmul.mubr.msk.bf16.vlgmr.msra.gmra.mrb[16].mxu1 %vm161_vm2, %v621_v7 }
 0x3f5   :  { %1614 = vmatprep.mubr.msk.bf16.mxu1 %vm1778_vm0, %v1777_v1 }
 0x3f9   :  { %1609 = vmatmul.mubr.msk.bf16.vlgmr.msra.gmra.mrb[28].mxu0 %vm161_vm2, %v622_v9 }
 0x3fa   :  { %1620 = vmatprep.mubr.msk.bf16.mxu0 %vm1778_vm0, %v1777_v1 }
 0x452   :  { %v2040_v10 = vpop.f32.mrb[4].mxu1 }
 0x453   :  { %v1568_v12 = vpop.f32.mrb[5].mxu1 }
 0x454   :  { %v455_v14 = vpop.f32.mrb[6].mxu1 }
 0x455   :  { %v1569_v15 = vpop.f32.mrb[7].mxu1 }
 0x4b3   :  { %v2042_v16 = vpop.f32.mrb[16].mxu0 }
 0x4b4   :  { %v1574_v13 = vpop.f32.mrb[17].mxu0 }
 0x4b5   :  { %v503_v17 = vpop.f32.mrb[18].mxu0 }
 0x4b6   :  { %v1575_v18 = vpop.f32.mrb[19].mxu0 }
 0x4b7   :  { %v2044_v20 = vpop.f32.mrb[8].mxu1 }
 0x4b8   :  { %v1580_v21 = vpop.f32.mrb[9].mxu1 }
 0x4b9   :  { %v551_v22 = vpop.f32.mrb[10].mxu1 }
 0x4ba   :  { %v1581_v23 = vpop.f32.mrb[11].mxu1 }
 0x4bb   :  { %v2046_v24 = vpop.f32.mrb[20].mxu0 }
 0x4bc   :  { %v1586_v25 = vpop.f32.mrb[21].mxu0 }
 0x4bd   :  { %v599_v26 = vpop.f32.mrb[22].mxu0 }
 0x4be   :  { %v1587_v27 = vpop.f32.mrb[23].mxu0 }
 0x4bf   :  { %v670_v28 = vpop.f32.mrb[12].mxu1 }
 0x4c0   :  { %v823_v29 = vsel %vm1932_vm3, %v670_v28, -1e+30  ;;  %v1592_v30 = vpop.f32.mrb[13].mxu1 }
 0x4c1   :  { %v673_v31 = vpop.f32.mrb[14].mxu1  ;;  %v827_v35 = vsel %vm161_vm2, %v823_v29, -inf }
 0x4c2   :  { %828 = vmax.xlane.f32.xlu0 %v827_v35  ;;  %v1593_v36 = vpop.f32.mrb[15].mxu1 }
 0x4c4   :  { %v719_v37 = vpop.f32.mrb[24].mxu0 }
 0x4c5   :  { %v824_v38 = vsel %vm1932_vm3, %v719_v37, -1e+30  ;;  %v1598_v40 = vpop.f32.mrb[25].mxu0 }
 0x4c6   :  { %v722_v41 = vpop.f32.mrb[26].mxu0  ;;  %v830_v42 = vsel %vm161_vm2, %v824_v38, -inf }
 0x4c7   :  { %831 = vmax.xlane.f32.xlu1 %v830_v42  ;;  %v1599_v43 = vpop.f32.mrb[27].mxu0  ;;  %v768_v44 = vpop.f32.mrb[16].mxu1 }
 0x4c8   :  { %v825_v45 = vsel %vm1932_vm3, %v768_v44, -1e+30  ;;  %v1604_v46 = vpop.f32.mrb[17].mxu1  ;;  %v1701_v44 = vld [vmem:[%s2198_s3] sm:$0xff]  }
 0x4c9   :  { %v771_v47 = vpop.f32.mrb[18].mxu1  ;;  %v833_v48 = vsel %vm161_vm2, %v825_v45, -inf }
 0x4ca   :  { %834 = vmax.xlane.f32.xlu0 %v833_v48  ;;  %v1605_v49 = vpop.f32.mrb[19].mxu1  ;;  %v1702_v48 = vld [vmem:[%s2198_s3 + $0x8] sm:$0xff]   ;;  %s1786_s3 = smov 24  }
 0x4cc   :  { %v817_v50 = vpop.f32.mrb[28].mxu0 }
 0x4cd   :  { %v826_v51 = vsel %vm1932_vm3, %v817_v50, -1e+30  ;;  %v1610_v52 = vpop.f32.mrb[29].mxu0 }
 0x4ce   :  { %v820_v53 = vpop.f32.mrb[30].mxu0  ;;  %v836_v54 = vsel %vm161_vm2, %v826_v51, -inf }
 0x4cf   :  { %837 = vmax.xlane.f32.xlu0 %v836_v54  ;;  %v1611_v55 = vpop.f32.mrb[31].mxu0 }
 0x4d8   :  { %875 = vrot.lane.b32.xlu1 %v1990_v34, %s1783_s2 }
 0x54f   :  { %v829_v56 = vpop.xlane.xlu0 %828 }
 0x550   :  { %v839_v57 = vsub.f32 %v823_v29, %v829_v56 }
 0x552   :  { %v843_v58 = vmul.f32 1.442695, %v839_v57 }
 0x554   :  { %1729 = vpow2.f32 %v843_v58  ;;  %v832_v59 = vpop.xlane.xlu1 %831 }
 0x555   :  { %v840_v60 = vsub.f32 %v824_v38, %v832_v59 }
 0x557   :  { %v845_v61 = vmul.f32 1.442695, %v840_v60  ;;  %v835_v62 = vpop.xlane.xlu0 %834 }
 0x558   :  { %v841_v63 = vsub.f32 %v825_v45, %v835_v62  ;;  %v876_v39 = vpop.permute.xlu1 %875 }
 0x559   :  { %1731 = vpow2.f32 %v845_v61  ;;  %v881_v0 = vsel %vm414_vm4, %v876_v39, 0 }
 0x55a   :  { %v847_v11 = vmul.f32 1.442695, %v841_v63  ;;  %1613 = vmatpush3.bf16.msra.mxu1 %v881_v0 }
 0x55b   :  { %1624 = vmatprep.subr.bf16.mxu1 %v1777_v1 }
 0x55c   :  { %1733 = vpow2.f32 %v847_v11  ;;  %v838_v2 = vpop.xlane.xlu0 %837 }
 0x55d   :  { %v842_v34 = vsub.f32 %v826_v51, %v838_v2 }
 0x55e   :  { %v1730_v5 = vpop.eup %1729 }
 0x55f   :  { %v849_v6 = vmul.f32 1.442695, %v842_v34  ;;  %v851_v7 = vsel %vm161_vm2, %v1730_v5, 0.0 }
 0x560   :  { %852 = vadd.xlane.f32.xlu1 %v851_v7 }
 0x561   :  { %1735 = vpow2.f32 %v849_v6 }
 0x563   :  { %v1732_v8 = vpop.eup %1731 }
 0x564   :  { %v854_v9 = vsel %vm161_vm2, %v1732_v8, 0.0 }
 0x565   :  { %855 = vadd.xlane.f32.xlu0 %v854_v9 }
 0x566   :  { %v1734_v12 = vpop.eup %1733 }
 0x567   :  { %v857_v14 = vsel %vm161_vm2, %v1734_v12, 0.0 }
 0x568   :  { %858 = vadd.xlane.f32.xlu1 %v857_v14 }
 0x56b   :  { %v1736_v15 = vpop.eup %1735 }
 0x56c   :  { %v860_v13 = vsel %vm161_vm2, %v1736_v15, 0.0 }
 0x56d   :  { %861 = vadd.xlane.f32.xlu0 %v860_v13  ;;  %v1703_v13 = vld [vmem:[%s2202_s7] sm:$0xff]  }
 0x579   :  { %971 = vrot.lane.b32.xlu1 %v1996_v19, %s1783_s2 }
 0x57d   :  { %1019 = vrot.lane.b32.xlu1 %v1984_v33, %s1783_s2 }
 0x583   :  { %923 = vrot.lane.b32.xlu0 %v1978_v32, %s1783_s2 }
 0x5ed   :  { %v853_v17 = vpop.xlane.xlu1 %852 }
 0x5ee   :  { %1737 = vrcp.f32 %v853_v17  ;;  %v1461_v17 = vld [vmem:[%s2199_s4] ss:$0 sm:$0xff] }
 0x5f2   :  { %v856_v18 = vpop.xlane.xlu0 %855 }
 0x5f3   :  { %1739 = vrcp.f32 %v856_v18 }
 0x5f5   :  { %v859_v21 = vpop.xlane.xlu1 %858 }
 0x5f6   :  { %1741 = vrcp.f32 %v859_v21 }
 0x5f8   :  { %v1738_v22 = vpop.eup %1737 }
 0x5f9   :  { %v867_v23 = vmul.f32 %v1738_v22, %v1730_v5  ;;  %v972_v25 = vpop.permute.xlu1 %971 }
 0x5fa   :  { %v862_v26 = vpop.xlane.xlu0 %861  ;;  %v977_v19 = vsel %vm414_vm4, %v972_v25, 0 }
 0x5fb   :  { %1743 = vrcp.f32 %v862_v26  ;;  %v871_v27 = vpack.c.bf16 %v867_v23, %v867_v23 }
 0x5fd   :  { %v1740_v28 = vpop.eup %1739  ;;  %1615 = vmatmul.mubr.msk.bf16.vlgmr.msra.gmra.mrb[20].mxu1 %vm161_vm2, %v871_v27  ;;  %v1020_v31 = vpop.permute.xlu1 %1019 }
 0x5fe   :  { %v868_v33 = vmul.f32 %v1740_v28, %v1732_v8  ;;  %1625 = vmatpush3.bf16.msra.mxu1 %v977_v19  ;;  %v924_v32 = vpop.permute.xlu0 %923  ;;  %1626 = vmatprep.mubr.msk.bf16.mxu1 %vm1778_vm0, %v1777_v1  ;;  %v1025_v37 = vsel %vm414_vm4, %v1020_v31, 0  ;;  %v1711_v31 = vld [vmem:[%s2204_s9 + $0x30] sm:$0xff]  }
 0x5ff   :  { %v929_v29 = vsel %vm414_vm4, %v924_v32, 0  ;;  %1636 = vmatprep.subr.bf16.mxu1 %v1777_v1  ;;  %v1708_v32 = vld [vmem:[%s2204_s9 + $0x18] sm:$0xff]  }
 0x600   :  { %v1742_v30 = vpop.eup %1741  ;;  %1619 = vmatpush3.bf16.msra.mxu0 %v929_v29  ;;  %v872_v35 = vpack.c.bf16 %v868_v33, %v868_v33  ;;  %v1705_v33 = vld [vmem:[%s2204_s9] sm:$0xff]  }
 0x601   :  { %v869_v36 = vmul.f32 %v1742_v30, %v1734_v12  ;;  %1630 = vmatprep.subr.bf16.mxu0 %v1777_v1  ;;  %v1709_v29 = vld [vmem:[%s2204_s9 + $0x20] sm:$0xff]   ;;  %v1710_v30 = vld [vmem:[%s2204_s9 + $0x28] sm:$0xff]  }
 0x603   :  { %1621 = vmatmul.mubr.msk.bf16.vlgmr.msra.gmra.mrb[32].mxu0 %vm161_vm2, %v872_v35  ;;  %v873_v38 = vpack.c.bf16 %v869_v36, %v869_v36  ;;  %v1712_v35 = vld [vmem:[%s2204_s9 + $0x38] sm:$0xff]   ;;  %v1467_v36 = vld [vmem:[%s2203_s8] ss:$0 sm:$0xff] }
 0x604   :  { %1631 = vmatpush3.bf16.msra.mxu0 %v1025_v37  ;;  %1632 = vmatprep.mubr.msk.bf16.mxu0 %vm1778_vm0, %v1777_v1 }
 0x605   :  { %v1744_v40 = vpop.eup %1743  ;;  %1627 = vmatmul.mubr.msk.bf16.vlgmr.msra.gmra.mrb[24].mxu1 %vm161_vm2, %v873_v38  ;;  %1644 = vmatprep.subr.bf16.mxu0 %v1777_v1 }
 0x606   :  { %v870_v41 = vmul.f32 %v1744_v40, %v1736_v15  ;;  %1640 = vmatprep.mubr.msk.bf16.mxu1 %vm1778_vm0, %v1777_v1  ;;  %1637 = vmatpush3.bf16.msra.mxu1 %v1701_v44 }
 0x607   :  { %1638 = vmatprep.subr.bf16.mxu1 %v1777_v1 }
 0x608   :  { %v874_v42 = vpack.c.bf16 %v870_v41, %v870_v41 }
 0x60a   :  { %1639 = vmatpush3.bf16.msra.mxu1 %v1702_v48 }
 0x60b   :  { %1633 = vmatmul.mubr.msk.bf16.vlgmr.msra.gmra.mrb[36].mxu0 %vm161_vm2, %v874_v42  ;;  %1652 = vmatprep.subr.bf16.mxu1 %v1777_v1 }
 0x60c   :  { %1648 = vmatprep.mubr.msk.bf16.mxu0 %vm1778_vm0, %v1777_v1  ;;  %1645 = vmatpush3.bf16.msra.mxu0 %v1703_v13 }
 0x60d   :  { %1646 = vmatprep.subr.bf16.mxu0 %v1777_v1 }
 0x6d0   :  { %v917_v43 = vpop.f32.mrb[20].mxu1 }
 0x6d1   :  { %v1616_v45 = vpop.f32.mrb[21].mxu1 }
 0x6d2   :  { %v920_v46 = vpop.f32.mrb[22].mxu1 }
 0x6d3   :  { %v1617_v47 = vpop.f32.mrb[23].mxu1 }
 0x6d6   :  { %v965_v49 = vpop.f32.mrb[32].mxu0 }
 0x6d7   :  { %v1684_v50 = vpack.i.bf16 %v965_v49, %v2042_v16  ;;  %v1622_v51 = vpop.f32.mrb[33].mxu0 }
 0x6d8   :  { %v968_v52 = vpop.f32.mrb[34].mxu0  ;;  %v1013_v53 = vpop.f32.mrb[24].mxu1 }
 0x6d9   :  { %v1689_v54 = vpack.i.bf16 %v1013_v53, %v2044_v20  ;;  %1685 = vrot.lane.b32.xlu0 %v1684_v50, %s1784_s24  ;;  %v1623_v55 = vpop.f32.mrb[35].mxu0  ;;  %v1628_v56 = vpop.f32.mrb[25].mxu1 }
 0x6da   :  { %v1016_v57 = vpop.f32.mrb[26].mxu1 }
 0x6db   :  { %1690 = vrot.lane.b32.xlu1 %v1689_v54, %s1785_s25  ;;  %v1629_v58 = vpop.f32.mrb[27].mxu1 }
 0x6de   :  { %v1061_v59 = vpop.f32.mrb[36].mxu0 }
 0x6df   :  { %v1694_v60 = vpack.i.bf16 %v1061_v59, %v2046_v24  ;;  %v1634_v16 = vpop.f32.mrb[37].mxu0 }
 0x6e0   :  { %v1064_v61 = vpop.f32.mrb[38].mxu0 }
 0x6e1   :  { %1695 = vrot.lane.b32.xlu0 %v1694_v60, %s1786_s3  ;;  %v1635_v62 = vpop.f32.mrb[39].mxu0 }
 0x74b   :  { %v1686_v63 = vpop.permute.xlu0 %1685 }
 0x74c   :  { %v1688_v20 = vunpack.i.h.bf16 %v1686_v63  ;;  %v1687_v0 = vunpack.i.l.bf16 %v1686_v63 }
 0x74d   :  { %v1691_v39 = vpop.permute.xlu1 %1690 }
 0x74e   :  { %v1693_v11 = vunpack.i.h.bf16 %v1691_v39  ;;  %v1692_v2 = vunpack.i.l.bf16 %v1691_v39  ;;  %v1079_v5 = vsel %vm161_vm2, %v917_v43, %v1688_v20  ;;  %v614_v6 = vsel %vm161_vm2, %v2040_v10, %v1687_v0  ;;  %v1704_v10 = vld [vmem:[%s2202_s7 + $0x8] sm:$0xff]  }
 0x74f   :  { %1647 = vmatpush3.bf16.msra.mxu0 %v1704_v10 }
 0x750   :  { %v616_v8 = vsel %vm615_vm5, %v614_v6, %v1692_v2  ;;  %v1080_v9 = vsel %vm615_vm5, %v1079_v5, %v1693_v11 }
 0x753   :  { %v1696_v34 = vpop.permute.xlu0 %1695 }
 0x754   :  { %v1698_v24 = vunpack.i.h.bf16 %v1696_v34  ;;  %v1697_v7 = vunpack.i.l.bf16 %v1696_v34 }
 0x756   :  { %v1081_v12 = vsel %vm617_vm6, %v1080_v9, %v1698_v24  ;;  %v618_v14 = vsel %vm617_vm6, %v616_v8, %v1697_v7 }
 0x757   :  { %v1082_v15 = vpack.c.bf16 %v1081_v12, %v618_v14 }
 0x759   :  { %1641 = vmatmul.mubr.msk.bf16.vlgmr.msra.gmra.mrb[28].mxu1 %vm72_vm1, %v1082_v15 }
 0x75a   :  { %1668 = vmatprep.mubr.msk.bf16.mxu1 %vm1778_vm0, %v1777_v1  ;;  %1653 = vmatpush3.bf16.msra.mxu1 %v1705_v33 }
 0x75b   :  { %1654 = vmatprep.subr.bf16.mxu1 %v1777_v1 }
 0x82c   :  { %v1143_v18 = vpop.f32.mrb[28].mxu1 }
 0x82d   :  { %v1144_v21 = vadd.f32 %v1461_v17, %v1143_v18  ;;  %v1642_v22 = vpop.f32.mrb[29].mxu1 }
 0x82e   :  { %v1146_v23 = vpop.f32.mrb[30].mxu1 }
 0x82f   :  { %v1147_v25 = vadd.f32 %v1461_v17, %v1146_v23  ;;  %v1643_v26 = vpop.f32.mrb[31].mxu1  ;;  %v2121_v27 = vadd.f32 %v1144_v21, %v1872_v3  ;;  %v1706_v3 = vld [vmem:[%s2204_s9 + $0x8] sm:$0xff]  }
 0x830   :  { %1655 = vmatpush3.bf16.msra.mxu1 %v1706_v3 }
 0x831   :  { %v2124_v28 = vadd.f32 %v1147_v25, %v1877_v4  ;;  %1656 = vmatprep.subr.bf16.mxu1 %v1777_v1  ;;  %v1707_v4 = vld [vmem:[%s2204_s9 + $0x10] sm:$0xff]  }
 0x833   :  { %v1170_v19 = vpack.c.bf16 %v2124_v28, %v2121_v27 }
 0x834   :  { %1657 = vmatpush3.bf16.msra.mxu1 %v1707_v4 }
 0x835   :  { %1649 = vmatmul.mubr.msk.bf16.vlgmr.msra.gmra.mrb[40].mxu0 %vm72_vm1, %v1170_v19  ;;  %1658 = vmatprep.subr.bf16.mxu1 %v1777_v1 }
 0x838   :  { %1659 = vmatpush3.bf16.msra.mxu1 %v1708_v32 }
 0x839   :  { %1660 = vmatprep.subr.bf16.mxu1 %v1777_v1 }
 0x83c   :  { %1661 = vmatpush3.bf16.msra.mxu1 %v1709_v29  ;;  %v1465_v29 = vld [vmem:[%s2200_s5] ss:$0 sm:$0xff] }
 0x83d   :  { %1662 = vmatprep.subr.bf16.mxu1 %v1777_v1 }
 0x840   :  { %1663 = vmatpush3.bf16.msra.mxu1 %v1710_v30  ;;  %v1159_v30 = vmul.f32 %v1465_v29, %v2121_v27 }
 0x841   :  { %1664 = vmatprep.subr.bf16.mxu1 %v1777_v1 }
 0x844   :  { %1665 = vmatpush3.bf16.msra.mxu1 %v1711_v31  ;;  %v1466_v31 = vld [vmem:[%s2201_s6] ss:$0 sm:$0xff] }
 0x845   :  { %1666 = vmatprep.subr.bf16.mxu1 %v1777_v1 }
 0x848   :  { %1667 = vmatpush3.bf16.msra.mxu1 %v1712_v35  ;;  %v1471_v35 = vld [vmem:[%s2205_s10] ss:$0 sm:$0xff]  ;;  %s1787_s10 = smov [#allocation2]  }
 0x849   :  { %s1430_s4 = sshll.u32 %s1787_s10, 4  ;;  %s1431_s4 = int_to_ptr.vmem [resolvable:$true] %s1430_s4 }
 0x84a   :  { %p1758_p1 = scmp.lt.s32.totalorder %s1431_s4, %s1431_s4 }
 0x908   :  { %v1231_v37 = vpop.f32.mrb[40].mxu0 }
 0x909   :  { %v1232_v38 = vadd.f32 %v1467_v36, %v1231_v37  ;;  %v1650_v40 = vpop.f32.mrb[41].mxu0 }
 0x90a   :  { %v1234_v41 = vpop.f32.mrb[42].mxu0 }
 0x90b   :  { %v1238_v42 = vmul.f32 0.70710677, %v1232_v38  ;;  %v1235_v43 = vadd.f32 %v1467_v36, %v1234_v41  ;;  %v1651_v44 = vpop.f32.mrb[43].mxu0  ;;  %v1284_v26 = vmul.f32 0.5, %v1232_v38  ;;  %v1160_v36 = vmul.f32 %v1465_v29, %v2124_v28 }
 0x90c   :  { %v1168_v38 = vadd.f32 %v1466_v31, %v1159_v30 }
 0x90d   :  { %v1240_v45 = vand.u32 2147483647, %v1238_v42  ;;  %v1239_v46 = vmul.f32 0.70710677, %v1235_v43  ;;  %vm1278_vm7 = vcmp.ge.f32.partialorder %v1238_v42, 0.0  ;;  %v1285_v19 = vmul.f32 0.5, %v1235_v43 }
 0x90e   :  { %v1480_v42 = vld [vmem:[%s2206_s11] ss:$0 sm:$0xff]  ;;  %v1169_v44 = vadd.f32 %v1466_v31, %v1160_v36  ;;  %s1753_s11 = scalar_lea.vmem %s1431_s4, 256 }
 0x90f   :  { %v1242_v47 = vmul.f32 0.3275911, %v1240_v45  ;;  %v1241_v1 = vand.u32 2147483647, %v1239_v46  ;;  %v1266_v51 = vsub.f32 0.0, %v1240_v45  ;;  %vm1279_vm8 = vcmp.ge.f32.partialorder %v1239_v46, 0.0  ;;  %p1754_p0 = scmp.ne.s32.totalorder %s1431_s4, %s1753_s11  ;;  %p1759_p2 = scmp.lt.s32.totalorder %s1753_s11, %s1753_s11 }
 0x911   :  { %v1244_v48 = vadd.f32 1.0, %v1242_v47  ;;  %v1243_v49 = vmul.f32 0.3275911, %v1241_v1  ;;  %v1267_v52 = vsub.f32 0.0, %v1241_v1  ;;  %v1268_v54 = vmul.f32 %v1266_v51, %v1240_v45  ;;  %v1481_v47 = vld [vmem:[%s2207_s12] ss:$0 sm:$0xff]  ;;  %p1760_p3 = por %p1759_p2, %p1758_p1 }
 0x913   :  { %1745 = vrcp.f32 %v1244_v48  ;;  %v1245_v50 = vadd.f32 1.0, %v1243_v49  ;;  %v1269_v58 = vmul.f32 %v1267_v52, %v1241_v1  ;;  %v1270_v59 = vmul.f32 1.442695, %v1268_v54  ;;  %p1761_p4 = pnand %p1760_p3, %p1754_p0 }
 0x915   :  { %1747 = vrcp.f32 %v1245_v50  ;;  %v1272_v63 = vmul.f32 1.442695, %v1269_v58 }
 0x916   :  { %1749 = vpow2.f32 %v1270_v59 }
 0x917   :  { %1751 = vpow2.f32 %v1272_v63 }
 0x91d   :  { %v1746_v53 = vpop.eup %1745 }
 0x91e   :  { %v1248_v55 = vmul.f32 1.0614054, %v1746_v53 }
 0x91f   :  { %v1748_v56 = vpop.eup %1747 }
 0x920   :  { %v1250_v57 = vadd.f32 -1.4531521, %v1248_v55  ;;  %v1249_v60 = vmul.f32 1.0614054, %v1748_v56  ;;  %v1750_v8 = vpop.eup %1749 }
 0x921   :  { %v1752_v15 = vpop.eup %1751 }
 0x922   :  { %v1252_v16 = vmul.f32 %v1746_v53, %v1250_v57  ;;  %v1251_v61 = vadd.f32 -1.4531521, %v1249_v60 }
 0x924   :  { %v1254_v62 = vadd.f32 1.4214138, %v1252_v16  ;;  %v1253_v39 = vmul.f32 %v1748_v56, %v1251_v61 }
 0x926   :  { %v1256_v20 = vmul.f32 %v1746_v53, %v1254_v62  ;;  %v1255_v0 = vadd.f32 1.4214138, %v1253_v39 }
 0x928   :  { %v1258_v11 = vadd.f32 -0.28449672, %v1256_v20  ;;  %v1257_v2 = vmul.f32 %v1748_v56, %v1255_v0 }
 0x92a   :  { %v1260_v34 = vmul.f32 %v1746_v53, %v1258_v11  ;;  %v1259_v5 = vadd.f32 -0.28449672, %v1257_v2 }
 0x92c   :  { %v1262_v6 = vadd.f32 0.2548296, %v1260_v34  ;;  %v1261_v24 = vmul.f32 %v1748_v56, %v1259_v5 }
 0x92e   :  { %v1264_v7 = vmul.f32 %v1746_v53, %v1262_v6  ;;  %v1263_v9 = vadd.f32 0.2548296, %v1261_v24 }
 0x930   :  { %v1274_v12 = vmul.f32 %v1750_v8, %v1264_v7  ;;  %v1265_v14 = vmul.f32 %v1748_v56, %v1263_v9 }
 0x932   :  { %v1276_v13 = vsub.f32 1.0, %v1274_v12  ;;  %v1275_v10 = vmul.f32 %v1752_v15, %v1265_v14 }
 0x934   :  { %v1280_v17 = vsub.f32 0.0, %v1276_v13  ;;  %v1277_v18 = vsub.f32 1.0, %v1275_v10 }
 0x936   :  { %v1282_v21 = vsel %vm1278_vm7, %v1276_v13, %v1280_v17  ;;  %v1281_v22 = vsub.f32 0.0, %v1277_v18 }
 0x937   :  { %v1286_v23 = vadd.f32 1.0, %v1282_v21 }
 0x938   :  { %v1283_v25 = vsel %vm1279_vm8, %v1277_v18, %v1281_v22 }
 0x939   :  { %v1287_v33 = vadd.f32 1.0, %v1283_v25  ;;  %v1288_v3 = vmul.f32 %v1286_v23, %v1284_v26 }
 0x93b   :  { %v1289_v4 = vmul.f32 %v1287_v33, %v1285_v19 }
 0x93d   :  { %v1290_v32 = vpack.c.bf16 %v1289_v4, %v1288_v3 }
 0x93f   :  { %1669 = vmatmul.mubr.bf16.vlgmr.msra.gmra.mrb[32].mxu1 %v1290_v32 }
 0xa12   :  { %v1396_v37 = vpop.f32.mrb[32].mxu1 }
 0xa13   :  { %v1397_v40 = vadd.f32 %v1471_v35, %v1396_v37  ;;  %v1670_v41 = vpop.f32.mrb[33].mxu1 }
 0xa14   :  { %v1399_v43 = vpop.f32.mrb[34].mxu1 }
 0xa15   :  { %v1403_v27 = vadd.f32 %v1397_v40, %v1168_v38  ;;  %v1400_v45 = vadd.f32 %v1471_v35, %v1399_v43  ;;  %v1671_v46 = vpop.f32.mrb[35].mxu1 }
 0xa17   :  { %v1412_v1 = vmul.f32 %v1480_v42, %v1403_v27  ;;  %v1404_v48 = vadd.f32 %v1400_v45, %v1169_v44 }
 0xa19   :  { %v1421_v28 = vadd.f32 %v1481_v47, %v1412_v1  ;;  %v1413_v49 = vmul.f32 %v1480_v42, %v1404_v48 }
 0xa1b   :  { %1423 = vst.msk [vmem:[#allocation2] sm:$0xff] %vm72_vm1, %v1421_v28  ;;  %v1422_v50 = vadd.f32 %v1481_v47, %v1413_v49 }
 0xa1d   :  { %1424 = vst.msk [vmem:[#allocation2 + $0x8] sm:$0xff] %vm72_vm1, %v1422_v50 }
 0xa1e   :  { %1764 = shalt.err (!%p1761_p4)
}
 0xa1f   :  { %s1765_s1 = scalar_lea.hbm %s2208_s13, 256 }
 0xa20   :  { %p1766_p5 = scmp.ne.s32.totalorder %s2208_s13, %s1765_s1  ;;  %p1769_p6 = scmp.lt.u32.totalorder %s1765_s1, %s2208_s13 }
 0xa22   :  { %p1771_p7 = pnand %p1769_p6, %p1766_p5 }
 0xa24   :  { %1774 = shalt.err (!%p1771_p7)
}
 0xa25   :  { %s1788_s2 = smov 128  }
 0xa26   :  { %1436 = dma.vmem_to_hbm [thread:$0]  %s1431_s4, 256, %s2208_s13, [#allocation3], %s1788_s2, %s1788_s2, %s1784_s24  }
 0xa27   :  { %1775 = dma.done.wait [#allocation3], 256  }
 0xa28   :  { %1776 = vsyncadd [#allocation3], 4294967040 }
 0xa29   :  { %1440 = vsyncpa [#allocation3], 1 }

// kernel: tpu_custom_call.1
= control target key start
LH: loop header
LB: loop body
LE: loop exit
PB: predicated region body
PF: predicated region fallthrough
CT: control target
= control target key end

     0   :  { %v1777_v1 = vmov 0.0   ;;  %vm1778_vm0 = vmmov 0   ;;  %vm72_vm1 = vcmask 261120   ;;  %s2195_s0 = inlined_call_operand.vmem [shape: f32[2,8,32], index: 0, kind: input, shape index: {}]   ;;  %s2196_s1 = inlined_call_operand.vmem [shape: bf16[32,96], index: 1, kind: input, shape index: {}]   ;;  %s2197_s2 = inlined_call_operand.vmem [shape: f32[1,96], index: 2, kind: input, shape index: {}]   ;;  %s2198_s3 = inlined_call_operand.vmem [shape: bf16[32,32], index: 3, kind: input, shape index: {}]   ;;  %s2199_s4 = inlined_call_operand.vmem [shape: f32[1,32], index: 4, kind: input, shape index: {}]   ;;  %s2200_s5 = inlined_call_operand.vmem [shape: f32[1,32], index: 5, kind: input, shape index: {}]   ;;  %s2201_s6 = inlined_call_operand.vmem [shape: f32[1,32], index: 6, kind: input, shape index: {}]   ;;  %s2202_s7 = inlined_call_operand.vmem [shape: bf16[32,128], index: 7, kind: input, shape index: {}]   ;;  %s2203_s8 = inlined_call_operand.vmem [shape: f32[1,128], index: 8, kind: input, shape index: {}]   ;;  %s2204_s9 = inlined_call_operand.vmem [shape: bf16[128,32], index: 9, kind: input, shape index: {}]   ;;  %s2205_s10 = inlined_call_operand.vmem [shape: f32[1,32], index: 10, kind: input, shape index: {}]   ;;  %s2206_s11 = inlined_call_operand.vmem [shape: f32[1,32], index: 11, kind: input, shape index: {}]   ;;  %s2207_s12 = inlined_call_operand.vmem [shape: f32[1,32], index: 12, kind: input, shape index: {}]   ;;  %s2208_s13 = inlined_call_operand.hbm [shape: f32[2,8,32], index: 13, kind: output, shape index: {}]  }
   0x1   :  { %v1699_v0 = vld [vmem:[%s2196_s1] sm:$0xff]   ;;  %1532 = vmatprep.subr.bf16.mxu0 %v1777_v1  ;;  %1552 = vmatprep.subr.bf16.mxu1 %v1777_v1  ;;  %v1700_v2 = vld [vmem:[%s2196_s1 + $0x8] sm:$0xff]  }
   0x2   :  { %1533 = vmatpush3.bf16.msra.mxu0 %v1699_v0  ;;  %1536 = vmatprep.mubr.msk.bf16.mxu0 %vm1778_vm0, %v1777_v1  ;;  %v1872_v3 = vld [vmem:[%s2195_s0] sm:$0xff]  ;;  %v1877_v4 = vld [vmem:[%s2195_s0 + $0x8] sm:$0xff] }
   0x3   :  { %1534 = vmatprep.subr.bf16.mxu0 %v1777_v1  ;;  %1554 = vmatprep.mubr.msk.bf16.mxu1 %vm1778_vm0, %v1777_v1  ;;  %v48_v5 = vpack.c.bf16 %v1877_v4, %v1872_v3 }
   0x6   :  { %1535 = vmatpush3.bf16.msra.mxu0 %v1700_v2 }
   0x7   :  { %1540 = vmatprep.subr.bf16.mxu0 %v1777_v1 }
   0x9   :  { %1537 = vmatmul.mubr.msk.bf16.vlgmr.msra.gmra.mrb[0].mxu0 %vm72_vm1, %v48_v5 }
   0xa   :  { %1542 = vmatprep.mubr.msk.bf16.mxu0 %vm1778_vm0, %v1777_v1 }
   0xb   :  { %18 = vsyncpa [#allocation3], 0  ;;  %v1441_v6 = vld [vmem:[%s2197_s2] ss:$0 sm:$0xff]  ;;  %s1779_s16 = smov 104   ;;  %s1780_s17 = smov 120   ;;  %v145_v36 = vlaneseq }
   0xc   :  { %s1781_s18 = smov 112   ;;  %s1782_s19 = smov 96   ;;  %vm161_vm2 = vcmask 64512   ;;  %vm414_vm4 = vcmask 1043456   ;;  %vm615_vm5 = vcmask 130048   ;;  %vm617_vm6 = vcmask 195584  }
   0xd   :  { %v146_v37 = vshrl.u32 %v145_v36, 7  ;;  %v148_v38 = vand.u32 127, %v145_v36  ;;  %s1783_s2 = smov 64   ;;  %s1784_s24 = smov 8  }
   0xe   :  { %s1785_s25 = smov 16  }
   0xf   :  { %vm1932_vm3 = vcmp.le.s32.totalorder %v148_v38, %v146_v37 }
  0xdc   :  { %v110_v7 = vpop.f32.mrb[0].mxu0 }
  0xdd   :  { %v111_v8 = vadd.f32 %v1441_v6, %v110_v7  ;;  %v1538_v9 = vpop.f32.mrb[1].mxu0 }
  0xde   :  { %v113_v10 = vpop.f32.mrb[2].mxu0 }
  0xdf   :  { %v1891_v11 = vadd.f32 %v1441_v6, %v113_v10  ;;  %131 = vrot.lane.b32.xlu1 %v111_v8, %s1779_s16  ;;  %119 = vrot.lane.b32.xlu0 %v111_v8, %s1780_s17  ;;  %v1539_v12 = vpop.f32.mrb[3].mxu0  ;;  %v1895_v13 = vpack.c.bf16 %v111_v8, %v111_v8  ;;  %v137_v22 = vmul.f32 0.35355338, %v111_v8 }
  0xe1   :  { %v150_v23 = vpack.c.bf16 %v137_v22, %v137_v22 }
  0xe3   :  { %125 = vrot.lane.b32.xlu0 %v111_v8, %s1781_s18  ;;  %159 = vrot.lane.b32.xlu1 %v1895_v13, %s1782_s19 }
 0x151   :  { %v132_v14 = vpop.permute.xlu1 %131  ;;  %v120_v15 = vpop.permute.xlu0 %119 }
 0x152   :  { %v1900_v16 = vpack.c.bf16 %v120_v15, %v120_v15  ;;  %v1904_v19 = vpack.c.bf16 %v132_v14, %v132_v14  ;;  %v139_v26 = vmul.f32 0.35355338, %v120_v15  ;;  %v143_v33 = vmul.f32 0.35355338, %v132_v14 }
 0x154   :  { %209 = vrot.lane.b32.xlu0 %v1900_v16, %s1782_s19  ;;  %v151_v30 = vpack.c.bf16 %v139_v26, %v139_v26  ;;  %v153_v35 = vpack.c.bf16 %v143_v33, %v143_v33 }
 0x155   :  { %v126_v17 = vpop.permute.xlu0 %125  ;;  %v160_v18 = vpop.permute.xlu1 %159 }
 0x156   :  { %v1906_v20 = vpack.c.bf16 %v126_v17, %v126_v17  ;;  %v166_v21 = vsel %vm161_vm2, %v160_v18, 0  ;;  %v141_v31 = vmul.f32 0.35355338, %v126_v17 }
 0x157   :  { %1541 = vmatpush3.bf16.xpose.msra.mxu0 %v166_v21 }
 0x158   :  { %307 = vrot.lane.b32.xlu0 %v1904_v19, %s1782_s19  ;;  %258 = vrot.lane.b32.xlu1 %v1906_v20, %s1782_s19  ;;  %v152_v34 = vpack.c.bf16 %v141_v31, %v141_v31 }
 0x159   :  { %1546 = vmatprep.subr.bf16.mxu0 %v1777_v1 }
 0x15e   :  { %1543 = vmatmul.mubr.msk.bf16.vlgmr.msra.gmra.mrb[4].mxu0 %vm161_vm2, %v150_v23 }
 0x15f   :  { %1548 = vmatprep.mubr.msk.bf16.mxu0 %vm1778_vm0, %v1777_v1 }
 0x1c6   :  { %v210_v24 = vpop.permute.xlu0 %209 }
 0x1c7   :  { %v215_v25 = vsel %vm161_vm2, %v210_v24, 0 }
 0x1c8   :  { %1547 = vmatpush3.bf16.xpose.msra.mxu0 %v215_v25 }
 0x1c9   :  { %1558 = vmatprep.subr.bf16.mxu0 %v1777_v1 }
 0x1ca   :  { %v259_v27 = vpop.permute.xlu1 %258  ;;  %v308_v29 = vpop.permute.xlu0 %307 }
 0x1cb   :  { %v264_v28 = vsel %vm161_vm2, %v259_v27, 0  ;;  %v313_v32 = vsel %vm161_vm2, %v308_v29, 0 }
 0x1cc   :  { %1553 = vmatpush3.bf16.xpose.msra.mxu1 %v264_v28 }
 0x1cd   :  { %1564 = vmatprep.subr.bf16.mxu1 %v1777_v1 }
 0x1cf   :  { %1549 = vmatmul.mubr.msk.bf16.vlgmr.msra.gmra.mrb[8].mxu0 %vm161_vm2, %v151_v30 }
 0x1d0   :  { %1559 = vmatpush3.bf16.xpose.msra.mxu0 %v313_v32  ;;  %1560 = vmatprep.mubr.msk.bf16.mxu0 %vm1778_vm0, %v1777_v1 }
 0x1d1   :  { %1570 = vmatprep.subr.bf16.mxu0 %v1777_v1 }
 0x1d3   :  { %1555 = vmatmul.mubr.msk.bf16.vlgmr.msra.gmra.mrb[0].mxu1 %vm161_vm2, %v152_v34  ;;  %v1990_v34 = vpack.c.bf16 %v1891_v11, %v1891_v11 }
 0x1d4   :  { %1566 = vmatprep.mubr.msk.bf16.mxu1 %vm1778_vm0, %v1777_v1 }
 0x1d7   :  { %1561 = vmatmul.mubr.msk.bf16.vlgmr.msra.gmra.mrb[12].mxu0 %vm161_vm2, %v153_v35 }
 0x1d8   :  { %1572 = vmatprep.mubr.msk.bf16.mxu0 %vm1778_vm0, %v1777_v1 }
 0x231   :  { %v202_v40 = vpop.f32.mrb[4].mxu0 }
 0x232   :  { %v357_v41 = vsel %vm1932_vm3, %v202_v40, -1e+30  ;;  %v1544_v42 = vpop.f32.mrb[5].mxu0 }
 0x233   :  { %v205_v43 = vpop.f32.mrb[6].mxu0  ;;  %v361_v44 = vsel %vm161_vm2, %v357_v41, -inf }
 0x234   :  { %362 = vmax.xlane.f32.xlu1 %v361_v44  ;;  %v1545_v45 = vpop.f32.mrb[7].mxu0 }
 0x2a2   :  { %v251_v46 = vpop.f32.mrb[8].mxu0 }
 0x2a3   :  { %v358_v47 = vsel %vm1932_vm3, %v251_v46, -1e+30  ;;  %v1550_v48 = vpop.f32.mrb[9].mxu0 }
 0x2a4   :  { %v254_v49 = vpop.f32.mrb[10].mxu0  ;;  %v364_v50 = vsel %vm161_vm2, %v358_v47, -inf }
 0x2a5   :  { %365 = vmax.xlane.f32.xlu0 %v364_v50  ;;  %v1551_v51 = vpop.f32.mrb[11].mxu0 }
 0x2a6   :  { %v300_v52 = vpop.f32.mrb[0].mxu1 }
 0x2a7   :  { %v359_v53 = vsel %vm1932_vm3, %v300_v52, -1e+30  ;;  %v1556_v54 = vpop.f32.mrb[1].mxu1 }
 0x2a8   :  { %v303_v55 = vpop.f32.mrb[2].mxu1  ;;  %v367_v56 = vsel %vm161_vm2, %v359_v53, -inf }
 0x2a9   :  { %v1557_v57 = vpop.f32.mrb[3].mxu1  ;;  %368 = vmax.xlane.f32.xlu0 %v367_v56 }
 0x2aa   :  { %v349_v58 = vpop.f32.mrb[12].mxu0 }
 0x2ab   :  { %v360_v59 = vsel %vm1932_vm3, %v349_v58, -1e+30  ;;  %v1562_v60 = vpop.f32.mrb[13].mxu0 }
 0x2ac   :  { %v352_v61 = vpop.f32.mrb[14].mxu0  ;;  %v370_v62 = vsel %vm161_vm2, %v360_v59, -inf }
 0x2ad   :  { %371 = vmax.xlane.f32.xlu1 %v370_v62  ;;  %v1563_v63 = vpop.f32.mrb[15].mxu0 }
 0x2be   :  { %127 = vrot.lane.b32.xlu1 %v1891_v11, %s1781_s18 }
 0x2bf   :  { %121 = vrot.lane.b32.xlu0 %v1891_v11, %s1780_s17 }
 0x2c1   :  { %v363_v0 = vpop.xlane.xlu1 %362 }
 0x2c2   :  { %133 = vrot.lane.b32.xlu1 %v1891_v11, %s1779_s16  ;;  %v373_v2 = vsub.f32 %v357_v41, %v363_v0 }
 0x2c3   :  { %458 = vrot.lane.b32.xlu0 %v1900_v16, %s1783_s2 }
 0x2c4   :  { %v377_v5 = vmul.f32 1.442695, %v373_v2 }
 0x2c6   :  { %409 = vrot.lane.b32.xlu1 %v1895_v13, %s1783_s2  ;;  %1713 = vpow2.f32 %v377_v5 }
 0x2ca   :  { %506 = vrot.lane.b32.xlu1 %v1906_v20, %s1783_s2 }
 0x2d0   :  { %v1714_v6 = vpop.eup %1713 }
 0x2d1   :  { %v385_v7 = vsel %vm161_vm2, %v1714_v6, 0.0 }
 0x2e2   :  { %386 = vadd.xlane.f32.xlu0 %v385_v7 }
 0x332   :  { %v366_v8 = vpop.xlane.xlu0 %365 }
 0x333   :  { %v374_v9 = vsub.f32 %v358_v47, %v366_v8 }
 0x335   :  { %v379_v10 = vmul.f32 1.442695, %v374_v9 }
 0x336   :  { %v369_v12 = vpop.xlane.xlu0 %368 }
 0x337   :  { %1715 = vpow2.f32 %v379_v10  ;;  %v375_v14 = vsub.f32 %v359_v53, %v369_v12 }
 0x339   :  { %v381_v15 = vmul.f32 1.442695, %v375_v14 }
 0x33a   :  { %v1961_v16 = vpop.permute.xlu0 %121  ;;  %v372_v13 = vpop.xlane.xlu1 %371 }
 0x33b   :  { %1717 = vpow2.f32 %v381_v15  ;;  %v376_v17 = vsub.f32 %v360_v59, %v372_v13  ;;  %v1978_v32 = vpack.c.bf16 %v1961_v16, %v1961_v16  ;;  %v138_v59 = vmul.f32 0.35355338, %v1891_v11 }
 0x33c   :  { %v140_v63 = vmul.f32 0.35355338, %v1961_v16 }
 0x33d   :  { %v383_v18 = vmul.f32 1.442695, %v376_v17  ;;  %v619_v62 = vpack.c.bf16 %v138_v59, %v138_v59 }
 0x33e   :  { %v459_v20 = vpop.permute.xlu0 %458  ;;  %v1963_v21 = vpop.permute.xlu1 %127  ;;  %v620_v5 = vpack.c.bf16 %v140_v63, %v140_v63 }
 0x33f   :  { %1719 = vpow2.f32 %v383_v18  ;;  %v464_v22 = vsel %vm414_vm4, %v459_v20, 0  ;;  %v142_v11 = vmul.f32 0.35355338, %v1963_v21 }
 0x340   :  { %1571 = vmatpush3.bf16.msra.mxu0 %v464_v22 }
 0x341   :  { %v1716_v23 = vpop.eup %1715  ;;  %1582 = vmatprep.subr.bf16.mxu0 %v1777_v1  ;;  %v621_v7 = vpack.c.bf16 %v142_v11, %v142_v11 }
 0x342   :  { %v1967_v24 = vpop.permute.xlu1 %133  ;;  %v388_v25 = vsel %vm161_vm2, %v1716_v23, 0.0 }
 0x343   :  { %389 = vadd.xlane.f32.xlu1 %v388_v25  ;;  %v1984_v33 = vpack.c.bf16 %v1967_v24, %v1967_v24  ;;  %v144_v8 = vmul.f32 0.35355338, %v1967_v24 }
 0x345   :  { %v1718_v26 = vpop.eup %1717  ;;  %v622_v9 = vpack.c.bf16 %v144_v8, %v144_v8 }
 0x346   :  { %v410_v27 = vpop.permute.xlu1 %409  ;;  %v391_v28 = vsel %vm161_vm2, %v1718_v26, 0.0 }
 0x347   :  { %v416_v29 = vsel %vm414_vm4, %v410_v27, 0  ;;  %392 = vadd.xlane.f32.xlu0 %v391_v28 }
 0x348   :  { %1565 = vmatpush3.bf16.msra.mxu1 %v416_v29 }
 0x349   :  { %v1720_v30 = vpop.eup %1719  ;;  %1576 = vmatprep.subr.bf16.mxu1 %v1777_v1 }
 0x34a   :  { %v394_v31 = vsel %vm161_vm2, %v1720_v30, 0.0  ;;  %v507_v38 = vpop.permute.xlu1 %506 }
 0x34b   :  { %395 = vadd.xlane.f32.xlu0 %v394_v31  ;;  %v512_v41 = vsel %vm414_vm4, %v507_v38, 0 }
 0x354   :  { %554 = vrot.lane.b32.xlu1 %v1904_v19, %s1783_s2  ;;  %v1996_v19 = vpack.c.bf16 %v1963_v21, %v1963_v21 }
 0x358   :  { %677 = vrot.lane.b32.xlu1 %v1978_v32, %s1782_s19 }
 0x35c   :  { %775 = vrot.lane.b32.xlu1 %v1984_v33, %s1782_s19 }
 0x361   :  { %628 = vrot.lane.b32.xlu0 %v1990_v34, %s1782_s19 }
 0x365   :  { %726 = vrot.lane.b32.xlu0 %v1996_v19, %s1782_s19 }
 0x36f   :  { %v387_v35 = vpop.xlane.xlu0 %386 }
 0x370   :  { %1721 = vrcp.f32 %v387_v35 }
 0x37a   :  { %v1722_v36 = vpop.eup %1721 }
 0x37b   :  { %v401_v37 = vmul.f32 %v1722_v36, %v1714_v6 }
 0x37d   :  { %v405_v40 = vpack.c.bf16 %v401_v37, %v401_v37 }
 0x37f   :  { %1567 = vmatmul.mubr.msk.bf16.vlgmr.msra.gmra.mrb[4].mxu1 %vm161_vm2, %v405_v40 }
 0x380   :  { %1577 = vmatpush3.bf16.msra.mxu1 %v512_v41  ;;  %1578 = vmatprep.mubr.msk.bf16.mxu1 %vm1778_vm0, %v1777_v1 }
 0x381   :  { %1588 = vmatprep.subr.bf16.mxu1 %v1777_v1 }
 0x3d0   :  { %v390_v42 = vpop.xlane.xlu1 %389 }
 0x3d1   :  { %1723 = vrcp.f32 %v390_v42 }
 0x3d4   :  { %v393_v43 = vpop.xlane.xlu0 %392  ;;  %v555_v47 = vpop.permute.xlu1 %554 }
 0x3d5   :  { %1725 = vrcp.f32 %v393_v43  ;;  %v560_v51 = vsel %vm414_vm4, %v555_v47, 0 }
 0x3d8   :  { %v396_v44 = vpop.xlane.xlu0 %395  ;;  %v678_v57 = vpop.permute.xlu1 %677 }
 0x3d9   :  { %1727 = vrcp.f32 %v396_v44  ;;  %v683_v60 = vsel %vm161_vm2, %v678_v57, 0 }
 0x3db   :  { %v1724_v45 = vpop.eup %1723 }
 0x3dc   :  { %v402_v46 = vmul.f32 %v1724_v45, %v1716_v23  ;;  %v629_v52 = vpop.permute.xlu0 %628  ;;  %v776_v2 = vpop.permute.xlu1 %775 }
 0x3dd   :  { %v634_v56 = vsel %vm161_vm2, %v629_v52, 0  ;;  %v781_v6 = vsel %vm161_vm2, %v776_v2, 0 }
 0x3de   :  { %v406_v48 = vpack.c.bf16 %v402_v46, %v402_v46 }
 0x3df   :  { %v1726_v49 = vpop.eup %1725 }
 0x3e0   :  { %v403_v50 = vmul.f32 %v1726_v49, %v1718_v26  ;;  %1573 = vmatmul.mubr.msk.bf16.vlgmr.msra.gmra.mrb[16].mxu0 %vm161_vm2, %v406_v48  ;;  %v727_v61 = vpop.permute.xlu0 %726 }
 0x3e1   :  { %1583 = vmatpush3.bf16.msra.mxu0 %v560_v51  ;;  %1584 = vmatprep.mubr.msk.bf16.mxu0 %vm1778_vm0, %v1777_v1  ;;  %v732_v0 = vsel %vm161_vm2, %v727_v61, 0 }
 0x3e2   :  { %v407_v53 = vpack.c.bf16 %v403_v50, %v403_v50  ;;  %1594 = vmatprep.subr.bf16.mxu0 %v1777_v1 }
 0x3e3   :  { %v1728_v54 = vpop.eup %1727 }
 0x3e4   :  { %v404_v55 = vmul.f32 %v1728_v54, %v1720_v30  ;;  %1579 = vmatmul.mubr.msk.bf16.vlgmr.msra.gmra.mrb[8].mxu1 %vm161_vm2, %v407_v53 }
 0x3e5   :  { %1589 = vmatpush3.bf16.xpose.msra.mxu1 %v634_v56  ;;  %1590 = vmatprep.mubr.msk.bf16.mxu1 %vm1778_vm0, %v1777_v1 }
 0x3e6   :  { %v408_v58 = vpack.c.bf16 %v404_v55, %v404_v55  ;;  %1600 = vmatprep.subr.bf16.mxu1 %v1777_v1 }
 0x3e8   :  { %1585 = vmatmul.mubr.msk.bf16.vlgmr.msra.gmra.mrb[20].mxu0 %vm161_vm2, %v408_v58 }
 0x3e9   :  { %1596 = vmatprep.mubr.msk.bf16.mxu0 %vm1778_vm0, %v1777_v1 }
 0x3ea   :  { %1595 = vmatpush3.bf16.xpose.msra.mxu0 %v683_v60 }
 0x3eb   :  { %1606 = vmatprep.subr.bf16.mxu0 %v1777_v1 }
 0x3ec   :  { %1591 = vmatmul.mubr.msk.bf16.vlgmr.msra.gmra.mrb[12].mxu1 %vm161_vm2, %v619_v62 }
 0x3ed   :  { %1601 = vmatpush3.bf16.xpose.msra.mxu1 %v732_v0  ;;  %1602 = vmatprep.mubr.msk.bf16.mxu1 %vm1778_vm0, %v1777_v1 }
 0x3ee   :  { %1612 = vmatprep.subr.bf16.mxu1 %v1777_v1 }
 0x3f1   :  { %1597 = vmatmul.mubr.msk.bf16.vlgmr.msra.gmra.mrb[24].mxu0 %vm161_vm2, %v620_v5 }
 0x3f2   :  { %1607 = vmatpush3.bf16.xpose.msra.mxu0 %v781_v6  ;;  %1608 = vmatprep.mubr.msk.bf16.mxu0 %vm1778_vm0, %v1777_v1 }
 0x3f3   :  { %1618 = vmatprep.subr.bf16.mxu0 %v1777_v1 }
 0x3f4   :  { %1603 = vmatmul.mubr.msk.bf16.vlgmr.msra.gmra.mrb[16].mxu1 %vm161_vm2, %v621_v7 }
 0x3f5   :  { %1614 = vmatprep.mubr.msk.bf16.mxu1 %vm1778_vm0, %v1777_v1 }
 0x3f9   :  { %1609 = vmatmul.mubr.msk.bf16.vlgmr.msra.gmra.mrb[28].mxu0 %vm161_vm2, %v622_v9 }
 0x3fa   :  { %1620 = vmatprep.mubr.msk.bf16.mxu0 %vm1778_vm0, %v1777_v1 }
 0x452   :  { %v2040_v10 = vpop.f32.mrb[4].mxu1 }
 0x453   :  { %v1568_v12 = vpop.f32.mrb[5].mxu1 }
 0x454   :  { %v455_v14 = vpop.f32.mrb[6].mxu1 }
 0x455   :  { %v1569_v15 = vpop.f32.mrb[7].mxu1 }
 0x4b3   :  { %v2042_v16 = vpop.f32.mrb[16].mxu0 }
 0x4b4   :  { %v1574_v13 = vpop.f32.mrb[17].mxu0 }
 0x4b5   :  { %v503_v17 = vpop.f32.mrb[18].mxu0 }
 0x4b6   :  { %v1575_v18 = vpop.f32.mrb[19].mxu0 }
 0x4b7   :  { %v2044_v20 = vpop.f32.mrb[8].mxu1 }
 0x4b8   :  { %v1580_v21 = vpop.f32.mrb[9].mxu1 }
 0x4b9   :  { %v551_v22 = vpop.f32.mrb[10].mxu1 }
 0x4ba   :  { %v1581_v23 = vpop.f32.mrb[11].mxu1 }
 0x4bb   :  { %v2046_v24 = vpop.f32.mrb[20].mxu0 }
 0x4bc   :  { %v1586_v25 = vpop.f32.mrb[21].mxu0 }
 0x4bd   :  { %v599_v26 = vpop.f32.mrb[22].mxu0 }
 0x4be   :  { %v1587_v27 = vpop.f32.mrb[23].mxu0 }
 0x4bf   :  { %v670_v28 = vpop.f32.mrb[12].mxu1 }
 0x4c0   :  { %v823_v29 = vsel %vm1932_vm3, %v670_v28, -1e+30  ;;  %v1592_v30 = vpop.f32.mrb[13].mxu1 }
 0x4c1   :  { %v673_v31 = vpop.f32.mrb[14].mxu1  ;;  %v827_v35 = vsel %vm161_vm2, %v823_v29, -inf }
 0x4c2   :  { %828 = vmax.xlane.f32.xlu0 %v827_v35  ;;  %v1593_v36 = vpop.f32.mrb[15].mxu1 }
 0x4c4   :  { %v719_v37 = vpop.f32.mrb[24].mxu0 }
 0x4c5   :  { %v824_v38 = vsel %vm1932_vm3, %v719_v37, -1e+30  ;;  %v1598_v40 = vpop.f32.mrb[25].mxu0 }
 0x4c6   :  { %v722_v41 = vpop.f32.mrb[26].mxu0  ;;  %v830_v42 = vsel %vm161_vm2, %v824_v38, -inf }
 0x4c7   :  { %831 = vmax.xlane.f32.xlu1 %v830_v42  ;;  %v1599_v43 = vpop.f32.mrb[27].mxu0  ;;  %v768_v44 = vpop.f32.mrb[16].mxu1 }
 0x4c8   :  { %v825_v45 = vsel %vm1932_vm3, %v768_v44, -1e+30  ;;  %v1604_v46 = vpop.f32.mrb[17].mxu1  ;;  %v1701_v44 = vld [vmem:[%s2198_s3] sm:$0xff]  }
 0x4c9   :  { %v771_v47 = vpop.f32.mrb[18].mxu1  ;;  %v833_v48 = vsel %vm161_vm2, %v825_v45, -inf }
 0x4ca   :  { %834 = vmax.xlane.f32.xlu0 %v833_v48  ;;  %v1605_v49 = vpop.f32.mrb[19].mxu1  ;;  %v1702_v48 = vld [vmem:[%s2198_s3 + $0x8] sm:$0xff]   ;;  %s1786_s3 = smov 24  }
 0x4cc   :  { %v817_v50 = vpop.f32.mrb[28].mxu0 }
 0x4cd   :  { %v826_v51 = vsel %vm1932_vm3, %v817_v50, -1e+30  ;;  %v1610_v52 = vpop.f32.mrb[29].mxu0 }
 0x4ce   :  { %v820_v53 = vpop.f32.mrb[30].mxu0  ;;  %v836_v54 = vsel %vm161_vm2, %v826_v51, -inf }
 0x4cf   :  { %837 = vmax.xlane.f32.xlu0 %v836_v54  ;;  %v1611_v55 = vpop.f32.mrb[31].mxu0 }
 0x4d8   :  { %875 = vrot.lane.b32.xlu1 %v1990_v34, %s1783_s2 }
 0x54f   :  { %v829_v56 = vpop.xlane.xlu0 %828 }
 0x550   :  { %v839_v57 = vsub.f32 %v823_v29, %v829_v56 }
 0x552   :  { %v843_v58 = vmul.f32 1.442695, %v839_v57 }
 0x554   :  { %1729 = vpow2.f32 %v843_v58  ;;  %v832_v59 = vpop.xlane.xlu1 %831 }
 0x555   :  { %v840_v60 = vsub.f32 %v824_v38, %v832_v59 }
 0x557   :  { %v845_v61 = vmul.f32 1.442695, %v840_v60  ;;  %v835_v62 = vpop.xlane.xlu0 %834 }
 0x558   :  { %v841_v63 = vsub.f32 %v825_v45, %v835_v62  ;;  %v876_v39 = vpop.permute.xlu1 %875 }
 0x559   :  { %1731 = vpow2.f32 %v845_v61  ;;  %v881_v0 = vsel %vm414_vm4, %v876_v39, 0 }
 0x55a   :  { %v847_v11 = vmul.f32 1.442695, %v841_v63  ;;  %1613 = vmatpush3.bf16.msra.mxu1 %v881_v0 }
 0x55b   :  { %1624 = vmatprep.subr.bf16.mxu1 %v1777_v1 }
 0x55c   :  { %1733 = vpow2.f32 %v847_v11  ;;  %v838_v2 = vpop.xlane.xlu0 %837 }
 0x55d   :  { %v842_v34 = vsub.f32 %v826_v51, %v838_v2 }
 0x55e   :  { %v1730_v5 = vpop.eup %1729 }
 0x55f   :  { %v849_v6 = vmul.f32 1.442695, %v842_v34  ;;  %v851_v7 = vsel %vm161_vm2, %v1730_v5, 0.0 }
 0x560   :  { %852 = vadd.xlane.f32.xlu1 %v851_v7 }
 0x561   :  { %1735 = vpow2.f32 %v849_v6 }
 0x563   :  { %v1732_v8 = vpop.eup %1731 }
 0x564   :  { %v854_v9 = vsel %vm161_vm2, %v1732_v8, 0.0 }
 0x565   :  { %855 = vadd.xlane.f32.xlu0 %v854_v9 }
 0x566   :  { %v1734_v12 = vpop.eup %1733 }
 0x567   :  { %v857_v14 = vsel %vm161_vm2, %v1734_v12, 0.0 }
 0x568   :  { %858 = vadd.xlane.f32.xlu1 %v857_v14 }
 0x56b   :  { %v1736_v15 = vpop.eup %1735 }
 0x56c   :  { %v860_v13 = vsel %vm161_vm2, %v1736_v15, 0.0 }
 0x56d   :  { %861 = vadd.xlane.f32.xlu0 %v860_v13  ;;  %v1703_v13 = vld [vmem:[%s2202_s7] sm:$0xff]  }
 0x579   :  { %971 = vrot.lane.b32.xlu1 %v1996_v19, %s1783_s2 }
 0x57d   :  { %1019 = vrot.lane.b32.xlu1 %v1984_v33, %s1783_s2 }
 0x583   :  { %923 = vrot.lane.b32.xlu0 %v1978_v32, %s1783_s2 }
 0x5ed   :  { %v853_v17 = vpop.xlane.xlu1 %852 }
 0x5ee   :  { %1737 = vrcp.f32 %v853_v17  ;;  %v1461_v17 = vld [vmem:[%s2199_s4] ss:$0 sm:$0xff] }
 0x5f2   :  { %v856_v18 = vpop.xlane.xlu0 %855 }
 0x5f3   :  { %1739 = vrcp.f32 %v856_v18 }
 0x5f5   :  { %v859_v21 = vpop.xlane.xlu1 %858 }
 0x5f6   :  { %1741 = vrcp.f32 %v859_v21 }
 0x5f8   :  { %v1738_v22 = vpop.eup %1737 }
 0x5f9   :  { %v867_v23 = vmul.f32 %v1738_v22, %v1730_v5  ;;  %v972_v25 = vpop.permute.xlu1 %971 }
 0x5fa   :  { %v862_v26 = vpop.xlane.xlu0 %861  ;;  %v977_v19 = vsel %vm414_vm4, %v972_v25, 0 }
 0x5fb   :  { %1743 = vrcp.f32 %v862_v26  ;;  %v871_v27 = vpack.c.bf16 %v867_v23, %v867_v23 }
 0x5fd   :  { %v1740_v28 = vpop.eup %1739  ;;  %1615 = vmatmul.mubr.msk.bf16.vlgmr.msra.gmra.mrb[20].mxu1 %vm161_vm2, %v871_v27  ;;  %v1020_v31 = vpop.permute.xlu1 %1019 }
 0x5fe   :  { %v868_v33 = vmul.f32 %v1740_v28, %v1732_v8  ;;  %1625 = vmatpush3.bf16.msra.mxu1 %v977_v19  ;;  %v924_v32 = vpop.permute.xlu0 %923  ;;  %1626 = vmatprep.mubr.msk.bf16.mxu1 %vm1778_vm0, %v1777_v1  ;;  %v1025_v37 = vsel %vm414_vm4, %v1020_v31, 0  ;;  %v1711_v31 = vld [vmem:[%s2204_s9 + $0x30] sm:$0xff]  }
 0x5ff   :  { %v929_v29 = vsel %vm414_vm4, %v924_v32, 0  ;;  %1636 = vmatprep.subr.bf16.mxu1 %v1777_v1  ;;  %v1708_v32 = vld [vmem:[%s2204_s9 + $0x18] sm:$0xff]  }
 0x600   :  { %v1742_v30 = vpop.eup %1741  ;;  %1619 = vmatpush3.bf16.msra.mxu0 %v929_v29  ;;  %v872_v35 = vpack.c.bf16 %v868_v33, %v868_v33  ;;  %v1705_v33 = vld [vmem:[%s2204_s9] sm:$0xff]  }
 0x601   :  { %v869_v36 = vmul.f32 %v1742_v30, %v1734_v12  ;;  %1630 = vmatprep.subr.bf16.mxu0 %v1777_v1  ;;  %v1709_v29 = vld [vmem:[%s2204_s9 + $0x20] sm:$0xff]   ;;  %v1710_v30 = vld [vmem:[%s2204_s9 + $0x28] sm:$0xff]  }
 0x603   :  { %1621 = vmatmul.mubr.msk.bf16.vlgmr.msra.gmra.mrb[32].mxu0 %vm161_vm2, %v872_v35  ;;  %v873_v38 = vpack.c.bf16 %v869_v36, %v869_v36  ;;  %v1712_v35 = vld [vmem:[%s2204_s9 + $0x38] sm:$0xff]   ;;  %v1467_v36 = vld [vmem:[%s2203_s8] ss:$0 sm:$0xff] }
 0x604   :  { %1631 = vmatpush3.bf16.msra.mxu0 %v1025_v37  ;;  %1632 = vmatprep.mubr.msk.bf16.mxu0 %vm1778_vm0, %v1777_v1 }
 0x605   :  { %v1744_v40 = vpop.eup %1743  ;;  %1627 = vmatmul.mubr.msk.bf16.vlgmr.msra.gmra.mrb[24].mxu1 %vm161_vm2, %v873_v38  ;;  %1644 = vmatprep.subr.bf16.mxu0 %v1777_v1 }
 0x606   :  { %v870_v41 = vmul.f32 %v1744_v40, %v1736_v15  ;;  %1640 = vmatprep.mubr.msk.bf16.mxu1 %vm1778_vm0, %v1777_v1  ;;  %1637 = vmatpush3.bf16.msra.mxu1 %v1701_v44 }
 0x607   :  { %1638 = vmatprep.subr.bf16.mxu1 %v1777_v1 }
 0x608   :  { %v874_v42 = vpack.c.bf16 %v870_v41, %v870_v41 }
 0x60a   :  { %1639 = vmatpush3.bf16.msra.mxu1 %v1702_v48 }
 0x60b   :  { %1633 = vmatmul.mubr.msk.bf16.vlgmr.msra.gmra.mrb[36].mxu0 %vm161_vm2, %v874_v42  ;;  %1652 = vmatprep.subr.bf16.mxu1 %v1777_v1 }
 0x60c   :  { %1648 = vmatprep.mubr.msk.bf16.mxu0 %vm1778_vm0, %v1777_v1  ;;  %1645 = vmatpush3.bf16.msra.mxu0 %v1703_v13 }
 0x60d   :  { %1646 = vmatprep.subr.bf16.mxu0 %v1777_v1 }
 0x6d0   :  { %v917_v43 = vpop.f32.mrb[20].mxu1 }
 0x6d1   :  { %v1616_v45 = vpop.f32.mrb[21].mxu1 }
 0x6d2   :  { %v920_v46 = vpop.f32.mrb[22].mxu1 }
 0x6d3   :  { %v1617_v47 = vpop.f32.mrb[23].mxu1 }
 0x6d6   :  { %v965_v49 = vpop.f32.mrb[32].mxu0 }
 0x6d7   :  { %v1684_v50 = vpack.i.bf16 %v965_v49, %v2042_v16  ;;  %v1622_v51 = vpop.f32.mrb[33].mxu0 }
 0x6d8   :  { %v968_v52 = vpop.f32.mrb[34].mxu0  ;;  %v1013_v53 = vpop.f32.mrb[24].mxu1 }
 0x6d9   :  { %v1689_v54 = vpack.i.bf16 %v1013_v53, %v2044_v20  ;;  %1685 = vrot.lane.b32.xlu0 %v1684_v50, %s1784_s24  ;;  %v1623_v55 = vpop.f32.mrb[35].mxu0  ;;  %v1628_v56 = vpop.f32.mrb[25].mxu1 }
 0x6da   :  { %v1016_v57 = vpop.f32.mrb[26].mxu1 }
 0x6db   :  { %1690 = vrot.lane.b32.xlu1 %v1689_v54, %s1785_s25  ;;  %v1629_v58 = vpop.f32.mrb[27].mxu1 }
 0x6de   :  { %v1061_v59 = vpop.f32.mrb[36].mxu0 }
 0x6df   :  { %v1694_v60 = vpack.i.bf16 %v1061_v59, %v2046_v24  ;;  %v1634_v16 = vpop.f32.mrb[37].mxu0 }
 0x6e0   :  { %v1064_v61 = vpop.f32.mrb[38].mxu0 }
 0x6e1   :  { %1695 = vrot.lane.b32.xlu0 %v1694_v60, %s1786_s3  ;;  %v1635_v62 = vpop.f32.mrb[39].mxu0 }
 0x74b   :  { %v1686_v63 = vpop.permute.xlu0 %1685 }
 0x74c   :  { %v1688_v20 = vunpack.i.h.bf16 %v1686_v63  ;;  %v1687_v0 = vunpack.i.l.bf16 %v1686_v63 }
 0x74d   :  { %v1691_v39 = vpop.permute.xlu1 %1690 }
 0x74e   :  { %v1693_v11 = vunpack.i.h.bf16 %v1691_v39  ;;  %v1692_v2 = vunpack.i.l.bf16 %v1691_v39  ;;  %v1079_v5 = vsel %vm161_vm2, %v917_v43, %v1688_v20  ;;  %v614_v6 = vsel %vm161_vm2, %v2040_v10, %v1687_v0  ;;  %v1704_v10 = vld [vmem:[%s2202_s7 + $0x8] sm:$0xff]  }
 0x74f   :  { %1647 = vmatpush3.bf16.msra.mxu0 %v1704_v10 }
 0x750   :  { %v616_v8 = vsel %vm615_vm5, %v614_v6, %v1692_v2  ;;  %v1080_v9 = vsel %vm615_vm5, %v1079_v5, %v1693_v11 }
 0x753   :  { %v1696_v34 = vpop.permute.xlu0 %1695 }
 0x754   :  { %v1698_v24 = vunpack.i.h.bf16 %v1696_v34  ;;  %v1697_v7 = vunpack.i.l.bf16 %v1696_v34 }
 0x756   :  { %v1081_v12 = vsel %vm617_vm6, %v1080_v9, %v1698_v24  ;;  %v618_v14 = vsel %vm617_vm6, %v616_v8, %v1697_v7 }
 0x757   :  { %v1082_v15 = vpack.c.bf16 %v1081_v12, %v618_v14 }
 0x759   :  { %1641 = vmatmul.mubr.msk.bf16.vlgmr.msra.gmra.mrb[28].mxu1 %vm72_vm1, %v1082_v15 }
 0x75a   :  { %1668 = vmatprep.mubr.msk.bf16.mxu1 %vm1778_vm0, %v1777_v1  ;;  %1653 = vmatpush3.bf16.msra.mxu1 %v1705_v33 }
 0x75b   :  { %1654 = vmatprep.subr.bf16.mxu1 %v1777_v1 }
 0x82c   :  { %v1143_v18 = vpop.f32.mrb[28].mxu1 }
 0x82d   :  { %v1144_v21 = vadd.f32 %v1461_v17, %v1143_v18  ;;  %v1642_v22 = vpop.f32.mrb[29].mxu1 }
 0x82e   :  { %v1146_v23 = vpop.f32.mrb[30].mxu1 }
 0x82f   :  { %v1147_v25 = vadd.f32 %v1461_v17, %v1146_v23  ;;  %v1643_v26 = vpop.f32.mrb[31].mxu1  ;;  %v2121_v27 = vadd.f32 %v1144_v21, %v1872_v3  ;;  %v1706_v3 = vld [vmem:[%s2204_s9 + $0x8] sm:$0xff]  }
 0x830   :  { %1655 = vmatpush3.bf16.msra.mxu1 %v1706_v3 }
 0x831   :  { %v2124_v28 = vadd.f32 %v1147_v25, %v1877_v4  ;;  %1656 = vmatprep.subr.bf16.mxu1 %v1777_v1  ;;  %v1707_v4 = vld [vmem:[%s2204_s9 + $0x10] sm:$0xff]  }
 0x833   :  { %v1170_v19 = vpack.c.bf16 %v2124_v28, %v2121_v27 }
 0x834   :  { %1657 = vmatpush3.bf16.msra.mxu1 %v1707_v4 }
 0x835   :  { %1649 = vmatmul.mubr.msk.bf16.vlgmr.msra.gmra.mrb[40].mxu0 %vm72_vm1, %v1170_v19  ;;  %1658 = vmatprep.subr.bf16.mxu1 %v1777_v1 }
 0x838   :  { %1659 = vmatpush3.bf16.msra.mxu1 %v1708_v32 }
 0x839   :  { %1660 = vmatprep.subr.bf16.mxu1 %v1777_v1 }
 0x83c   :  { %1661 = vmatpush3.bf16.msra.mxu1 %v1709_v29  ;;  %v1465_v29 = vld [vmem:[%s2200_s5] ss:$0 sm:$0xff] }
 0x83d   :  { %1662 = vmatprep.subr.bf16.mxu1 %v1777_v1 }
 0x840   :  { %1663 = vmatpush3.bf16.msra.mxu1 %v1710_v30  ;;  %v1159_v30 = vmul.f32 %v1465_v29, %v2121_v27 }
 0x841   :  { %1664 = vmatprep.subr.bf16.mxu1 %v1777_v1 }
 0x844   :  { %1665 = vmatpush3.bf16.msra.mxu1 %v1711_v31  ;;  %v1466_v31 = vld [vmem:[%s2201_s6] ss:$0 sm:$0xff] }
 0x845   :  { %1666 = vmatprep.subr.bf16.mxu1 %v1777_v1 }
 0x848   :  { %1667 = vmatpush3.bf16.msra.mxu1 %v1712_v35  ;;  %v1471_v35 = vld [vmem:[%s2205_s10] ss:$0 sm:$0xff]  ;;  %s1787_s10 = smov [#allocation2]  }
 0x849   :  { %s1430_s4 = sshll.u32 %s1787_s10, 4  ;;  %s1431_s4 = int_to_ptr.vmem [resolvable:$true] %s1430_s4 }
 0x84a   :  { %p1758_p1 = scmp.lt.s32.totalorder %s1431_s4, %s1431_s4 }
 0x908   :  { %v1231_v37 = vpop.f32.mrb[40].mxu0 }
 0x909   :  { %v1232_v38 = vadd.f32 %v1467_v36, %v1231_v37  ;;  %v1650_v40 = vpop.f32.mrb[41].mxu0 }
 0x90a   :  { %v1234_v41 = vpop.f32.mrb[42].mxu0 }
 0x90b   :  { %v1238_v42 = vmul.f32 0.70710677, %v1232_v38  ;;  %v1235_v43 = vadd.f32 %v1467_v36, %v1234_v41  ;;  %v1651_v44 = vpop.f32.mrb[43].mxu0  ;;  %v1284_v26 = vmul.f32 0.5, %v1232_v38  ;;  %v1160_v36 = vmul.f32 %v1465_v29, %v2124_v28 }
 0x90c   :  { %v1168_v38 = vadd.f32 %v1466_v31, %v1159_v30 }
 0x90d   :  { %v1240_v45 = vand.u32 2147483647, %v1238_v42  ;;  %v1239_v46 = vmul.f32 0.70710677, %v1235_v43  ;;  %vm1278_vm7 = vcmp.ge.f32.partialorder %v1238_v42, 0.0  ;;  %v1285_v19 = vmul.f32 0.5, %v1235_v43 }
 0x90e   :  { %v1480_v42 = vld [vmem:[%s2206_s11] ss:$0 sm:$0xff]  ;;  %v1169_v44 = vadd.f32 %v1466_v31, %v1160_v36  ;;  %s1753_s11 = scalar_lea.vmem %s1431_s4, 256 }
 0x90f   :  { %v1242_v47 = vmul.f32 0.3275911, %v1240_v45  ;;  %v1241_v1 = vand.u32 2147483647, %v1239_v46  ;;  %v1266_v51 = vsub.f32 0.0, %v1240_v45  ;;  %vm1279_vm8 = vcmp.ge.f32.partialorder %v1239_v46, 0.0  ;;  %p1754_p0 = scmp.ne.s32.totalorder %s1431_s4, %s1753_s11  ;;  %p1759_p2 = scmp.lt.s32.totalorder %s1753_s11, %s1753_s11 }
 0x911   :  { %v1244_v48 = vadd.f32 1.0, %v1242_v47  ;;  %v1243_v49 = vmul.f32 0.3275911, %v1241_v1  ;;  %v1267_v52 = vsub.f32 0.0, %v1241_v1  ;;  %v1268_v54 = vmul.f32 %v1266_v51, %v1240_v45  ;;  %v1481_v47 = vld [vmem:[%s2207_s12] ss:$0 sm:$0xff]  ;;  %p1760_p3 = por %p1759_p2, %p1758_p1 }
 0x913   :  { %1745 = vrcp.f32 %v1244_v48  ;;  %v1245_v50 = vadd.f32 1.0, %v1243_v49  ;;  %v1269_v58 = vmul.f32 %v1267_v52, %v1241_v1  ;;  %v1270_v59 = vmul.f32 1.442695, %v1268_v54  ;;  %p1761_p4 = pnand %p1760_p3, %p1754_p0 }
 0x915   :  { %1747 = vrcp.f32 %v1245_v50  ;;  %v1272_v63 = vmul.f32 1.442695, %v1269_v58 }
 0x916   :  { %1749 = vpow2.f32 %v1270_v59 }
 0x917   :  { %1751 = vpow2.f32 %v1272_v63 }
 0x91d   :  { %v1746_v53 = vpop.eup %1745 }
 0x91e   :  { %v1248_v55 = vmul.f32 1.0614054, %v1746_v53 }
 0x91f   :  { %v1748_v56 = vpop.eup %1747 }
 0x920   :  { %v1250_v57 = vadd.f32 -1.4531521, %v1248_v55  ;;  %v1249_v60 = vmul.f32 1.0614054, %v1748_v56  ;;  %v1750_v8 = vpop.eup %1749 }
 0x921   :  { %v1752_v15 = vpop.eup %1751 }
 0x922   :  { %v1252_v16 = vmul.f32 %v1746_v53, %v1250_v57  ;;  %v1251_v61 = vadd.f32 -1.4531521, %v1249_v60 }
 0x924   :  { %v1254_v62 = vadd.f32 1.4214138, %v1252_v16  ;;  %v1253_v39 = vmul.f32 %v1748_v56, %v1251_v61 }
 0x926   :  { %v1256_v20 = vmul.f32 %v1746_v53, %v1254_v62  ;;  %v1255_v0 = vadd.f32 1.4214138, %v1253_v39 }
 0x928   :  { %v1258_v11 = vadd.f32 -0.28449672, %v1256_v20  ;;  %v1257_v2 = vmul.f32 %v1748_v56, %v1255_v0 }
 0x92a   :  { %v1260_v34 = vmul.f32 %v1746_v53, %v1258_v11  ;;  %v1259_v5 = vadd.f32 -0.28449672, %v1257_v2 }
 0x92c   :  { %v1262_v6 = vadd.f32 0.2548296, %v1260_v34  ;;  %v1261_v24 = vmul.f32 %v1748_v56, %v1259_v5 }
 0x92e   :  { %v1264_v7 = vmul.f32 %v1746_v53, %v1262_v6  ;;  %v1263_v9 = vadd.f32 0.2548296, %v1261_v24 }
 0x930   :  { %v1274_v12 = vmul.f32 %v1750_v8, %v1264_v7  ;;  %v1265_v14 = vmul.f32 %v1748_v56, %v1263_v9 }
 0x932   :  { %v1276_v13 = vsub.f32 1.0, %v1274_v12  ;;  %v1275_v10 = vmul.f32 %v1752_v15, %v1265_v14 }
 0x934   :  { %v1280_v17 = vsub.f32 0.0, %v1276_v13  ;;  %v1277_v18 = vsub.f32 1.0, %v1275_v10 }
 0x936   :  { %v1282_v21 = vsel %vm1278_vm7, %v1276_v13, %v1280_v17  ;;  %v1281_v22 = vsub.f32 0.0, %v1277_v18 }
 0x937   :  { %v1286_v23 = vadd.f32 1.0, %v1282_v21 }
 0x938   :  { %v1283_v25 = vsel %vm1279_vm8, %v1277_v18, %v1281_v22 }
 0x939   :  { %v1287_v33 = vadd.f32 1.0, %v1283_v25  ;;  %v1288_v3 = vmul.f32 %v1286_v23, %v1284_v26 }
 0x93b   :  { %v1289_v4 = vmul.f32 %v1287_v33, %v1285_v19 }
 0x93d   :  { %v1290_v32 = vpack.c.bf16 %v1289_v4, %v1288_v3 }
 0x93f   :  { %1669 = vmatmul.mubr.bf16.vlgmr.msra.gmra.mrb[32].mxu1 %v1290_v32 }
 0xa12   :  { %v1396_v37 = vpop.f32.mrb[32].mxu1 }
 0xa13   :  { %v1397_v40 = vadd.f32 %v1471_v35, %v1396_v37  ;;  %v1670_v41 = vpop.f32.mrb[33].mxu1 }
 0xa14   :  { %v1399_v43 = vpop.f32.mrb[34].mxu1 }
 0xa15   :  { %v1403_v27 = vadd.f32 %v1397_v40, %v1168_v38  ;;  %v1400_v45 = vadd.f32 %v1471_v35, %v1399_v43  ;;  %v1671_v46 = vpop.f32.mrb[35].mxu1 }
 0xa17   :  { %v1412_v1 = vmul.f32 %v1480_v42, %v1403_v27  ;;  %v1404_v48 = vadd.f32 %v1400_v45, %v1169_v44 }
 0xa19   :  { %v1421_v28 = vadd.f32 %v1481_v47, %v1412_v1  ;;  %v1413_v49 = vmul.f32 %v1480_v42, %v1404_v48 }
 0xa1b   :  { %1423 = vst.msk [vmem:[#allocation2] sm:$0xff] %vm72_vm1, %v1421_v28  ;;  %v1422_v50 = vadd.f32 %v1481_v47, %v1413_v49 }
 0xa1d   :  { %1424 = vst.msk [vmem:[#allocation2 + $0x8] sm:$0xff] %vm72_vm1, %v1422_v50 }
 0xa1e   :  { %1764 = shalt.err (!%p1761_p4)
}
 0xa1f   :  { %s1765_s1 = scalar_lea.hbm %s2208_s13, 256 }
 0xa20   :  { %p1766_p5 = scmp.ne.s32.totalorder %s2208_s13, %s1765_s1  ;;  %p1769_p6 = scmp.lt.u32.totalorder %s1765_s1, %s2208_s13 }
 0xa22   :  { %p1771_p7 = pnand %p1769_p6, %p1766_p5 }
 0xa24   :  { %1774 = shalt.err (!%p1771_p7)
}
 0xa25   :  { %s1788_s2 = smov 128  }
 0xa26   :  { %1436 = dma.vmem_to_hbm [thread:$0]  %s1431_s4, 256, %s2208_s13, [#allocation3], %s1788_s2, %s1788_s2, %s1784_s24  }
 0xa27   :  { %1775 = dma.done.wait [#allocation3], 256  }
 0xa28   :  { %1776 = vsyncadd [#allocation3], 4294967040 }
 0xa29   :  { %1440 = vsyncpa [#allocation3], 1 }

</bundles_post_ra>
